<compile_context>
chip_gen: v7x
topology: tpu7x:2x2x1
jax: 0.10.0
libtpu: 0.0.40
codegen_flags: <defaults>
</compile_context>

<pallas_src>
import functools
import math

import jax
import jax.numpy as jnp
from jax.experimental import pallas as pl
from jax.experimental.pallas import tpu as pltpu


DIM = 8        # se3 transformer feature dim (matches feature_proj: Linear(1, 8))
HID = 16       # classifier / FFN hidden dim
LANES = 128    # lane width of the padded output / packed param slab

# Packed-parameter slab layout (matrix blocks start on 8-row boundaries).
R_WP = 0       # (1, 8)   feature_proj weight (row vector)
R_BP = 1       # (1, 8)   feature_proj bias
R_WPQKV = 2    # (1, 24)  wp @ [wq*scale | wk | wv]        (fused proj, rank-1)
R_BQKV = 3     # (1, 24)  bp @ wqkv + [bq*scale | bk | bv]
R_BO = 4       # (1, 8)
R_BF1 = 5      # (1, 16)
R_BF2 = 6      # (1, 8)
R_BC1 = 7      # (1, 16)
R_WO = 8       # (8, 8)
R_WF1 = 16     # (8, 16)
R_WF2 = 24     # (16, 8)
R_WC1 = 40     # (8, 16)
R_WC2 = 48     # (16, 128) classifier weight, zero-padded to 128 lanes
R_BC2 = 64     # (1, 128)  classifier bias, zero-padded
SLAB_ROWS = 72


def se3_cls_kernel(data_ref, p_ref, rp_ref, out_ref):
    bt = out_ref.shape[0]              # batch elements in this block
    n = data_ref.shape[0] // bt        # points per batch element

    # ---- parameters (sliced once from the resident packed slab) ----
    wp = p_ref[R_WP:R_WP + 1, 0:DIM]            # (1, 8)
    bp = p_ref[R_BP:R_BP + 1, 0:DIM]            # (1, 8)
    wpqkv = p_ref[R_WPQKV:R_WPQKV + 1, 0:3 * DIM]   # (1, 24)
    bqkv = p_ref[R_BQKV:R_BQKV + 1, 0:3 * DIM]      # (1, 24)
    bo = p_ref[R_BO:R_BO + 1, 0:DIM]
    bf1 = p_ref[R_BF1:R_BF1 + 1, 0:HID]
    bf2 = p_ref[R_BF2:R_BF2 + 1, 0:DIM]
    bc1 = p_ref[R_BC1:R_BC1 + 1, 0:HID]
    wo = p_ref[R_WO:R_WO + DIM, 0:DIM]          # (8, 8)
    wf1 = p_ref[R_WF1:R_WF1 + DIM, 0:HID]       # (8, 16)
    wf2 = p_ref[R_WF2:R_WF2 + HID, 0:DIM]       # (16, 8)
    wc1 = p_ref[R_WC1:R_WC1 + DIM, 0:HID]       # (8, 16)
    wc2 = p_ref[R_WC2:R_WC2 + HID, :]           # (16, 128) lane-padded
    bc2 = p_ref[R_BC2:R_BC2 + 1, :]             # (1, 128)  lane-padded

    # radial-gate scalars from SMEM: [rk_w, rk_b, rv_w, rv_b]
    rk_w = rp_ref[0]
    rk_b = rp_ref[1]
    rv_w = rp_ref[2]
    rv_b = rp_ref[3]

    # ---- batched (block-wide) projections: pure VPU rank-1 broadcasts ----
    data = data_ref[...]                        # (bt*n, 4)  [x, y, z, feat]
    coords = data[:, 0:3]                       # (bt*n, 3)
    feat = data[:, 3:4]                         # (bt*n, 1)

    x = feat * wp + bp                          # feature_proj        (bt*n, 8)
    qkv = feat * wpqkv + bqkv                   # fused scaled Q|K|V  (bt*n, 24)

    ones13 = jnp.ones((1, 3), jnp.float32)
    dn_t = (((1,), (1,)), ((), ()))             # A contracted with B^T

    # ---- per-batch-element attention (the only N x N work) ----
    ctx_parts = []
    pooled_parts = None  # pooling done after the batched FFN below
    for b in range(bt):
        lo, hi = b * n, (b + 1) * n
        c = coords[lo:hi, :]                    # (N, 3)
        q = qkv[lo:hi, 0:DIM]                   # scale already folded into q
        k = qkv[lo:hi, DIM:2 * DIM]
        v = qkv[lo:hi, 2 * DIM:3 * DIM]

        # SE(3)-invariant squared distances via the Gram identity:
        # d2_ij = |c_i|^2 + |c_j|^2 - 2 c_i . c_j   (no (N,N,3) intermediate)
        cc = c * c
        r2_col = jnp.sum(cc, axis=1, keepdims=True)                       # (N, 1)
        r2_row = jax.lax.dot_general(ones13, cc, dn_t,
                                     preferred_element_type=jnp.float32)  # (1, N)
        gram = jax.lax.dot_general(c, c, dn_t,
                                   preferred_element_type=jnp.float32)    # (N, N)
        d2 = jnp.maximum(r2_col + r2_row - 2.0 * gram, 0.0)

        # distance gates on d^2 (radial-MLP approximation; no sqrt, no log)
        k_gate = jax.nn.sigmoid(d2 * rk_w + rk_b)                         # (N, N)
        v_gate = jax.nn.sigmoid(d2 * rv_w + rv_b)                         # (N, N)

        scores = jax.lax.dot_general(q, k, dn_t,
                                     preferred_element_type=jnp.float32)  # (N, N)
        m = jnp.max(scores, axis=-1, keepdims=True)
        ek = jnp.exp(scores - m) * k_gate
        denom = jnp.sum(ek, axis=-1, keepdims=True) + 1e-20
        num = jnp.dot(ek * v_gate, v, preferred_element_type=jnp.float32)  # (N, 8)
        # deferred normalization: reciprocal broadcast hits (N,8), not (N,N)
        ctx_parts.append(num * pl.reciprocal(denom, approx=True))

    ctx = ctx_parts[0] if bt == 1 else jnp.concatenate(ctx_parts, axis=0)  # (bt*n, 8)

    # ---- batched residual attention output projection + residual FFN ----
    x = x + jnp.dot(ctx, wo, preferred_element_type=jnp.float32) + bo
    h = jnp.maximum(jnp.dot(x, wf1, preferred_element_type=jnp.float32) + bf1, 0.0)
    x = x + jnp.dot(h, wf2, preferred_element_type=jnp.float32) + bf2      # (bt*n, 8)

    # ---- max pool over points per batch element ----
    pooled_parts = [
        jnp.max(x[b * n:(b + 1) * n, :], axis=0, keepdims=True) for b in range(bt)
    ]
    pooled = (pooled_parts[0] if bt == 1
              else jnp.concatenate(pooled_parts, axis=0))                  # (bt, 8)

    # ---- batched classifier head: Linear(8,16) -> ReLU -> Linear(16, C[pad 128]) ----
    h2 = jnp.maximum(
        jnp.dot(pooled, wc1, preferred_element_type=jnp.float32) + bc1, 0.0)
    out_ref[...] = jnp.dot(h2, wc2, preferred_element_type=jnp.float32) + bc2


def _pack_params(params, num_classes):
    """Pack all parameters into one (SLAB_ROWS, 128) f32 slab (host-side algebra)."""
    scale = 1.0 / math.sqrt(DIM)
    # fold 1/sqrt(DIM) into the Q columns, and feature_proj into the fused QKV proj
    wqkv = jnp.concatenate(
        [params["wq"] * scale, params["wk"], params["wv"]], axis=1)   # (8, 24)
    bqkv = jnp.concatenate(
        [params["bq"] * scale, params["bk"], params["bv"]], axis=1)   # (1, 24)
    wpqkv = params["wp"] @ wqkv                                       # (1, 24)
    bqkv_eff = params["bp"] @ wqkv + bqkv                             # (1, 24)

    wc2p = jnp.zeros((HID, LANES), jnp.float32).at[:, :num_classes].set(params["wc2"])
    bc2p = jnp.zeros((LANES,), jnp.float32).at[:num_classes].set(params["bc2"][0])

    slab = jnp.zeros((SLAB_ROWS, LANES), jnp.float32)
    slab = slab.at[R_WP, 0:DIM].set(params["wp"][0])
    slab = slab.at[R_BP, 0:DIM].set(params["bp"][0])
    slab = slab.at[R_WPQKV, 0:3 * DIM].set(wpqkv[0])
    slab = slab.at[R_BQKV, 0:3 * DIM].set(bqkv_eff[0])
    slab = slab.at[R_BO, 0:DIM].set(params["bo"][0])
    slab = slab.at[R_BF1, 0:HID].set(params["bf1"][0])
    slab = slab.at[R_BF2, 0:DIM].set(params["bf2"][0])
    slab = slab.at[R_BC1, 0:HID].set(params["bc1"][0])
    slab = slab.at[R_WO:R_WO + DIM, 0:DIM].set(params["wo"])
    slab = slab.at[R_WF1:R_WF1 + DIM, 0:HID].set(params["wf1"])
    slab = slab.at[R_WF2:R_WF2 + HID, 0:DIM].set(params["wf2"])
    slab = slab.at[R_WC1:R_WC1 + DIM, 0:HID].set(params["wc1"])
    slab = slab.at[R_WC2:R_WC2 + HID, :].set(wc2p)
    slab = slab.at[R_BC2, :].set(bc2p)

    # scalar radial-gate params -> SMEM: [rk_w, rk_b, rv_w, rv_b]
    rp_vec = params["rp"].reshape(-1).astype(jnp.float32)
    return slab, rp_vec


@functools.partial(jax.jit, static_argnames=("block_b",))
def se3_classification_forward(features, coords, params, block_b=None):
    B, N = coords.shape[0], coords.shape[1]
    num_classes = params["wc2"].shape[1]
    assert num_classes <= LANES
    features = features.reshape(B, N, 1).astype(jnp.float32)
    coords = coords.astype(jnp.float32)

    # ---- block / grid sizing ----
    if block_b is None:
        # coarse blocks amortize the ~0.35us/step overhead (single-TC v5e/v6e);
        # cap keeps the unrolled (N,N) live set comfortably inside VMEM.
        block_b = min(32, B)
    block_b = 8 * pl.cdiv(block_b, 8)            # multiple of 8 -> (8k,128) output block
    grid_b = pl.cdiv(B, block_b)
    if grid_b > 1 and grid_b % 2 == 1:           # even grid keeps both v7x TCs busy
        grid_b += 1
        block_b = 8 * pl.cdiv(pl.cdiv(B, grid_b), 8)
        grid_b = pl.cdiv(B, block_b)
    b_pad = grid_b * block_b

    # ---- single packed data stream: [x | y | z | feat] ----
    data = jnp.concatenate([coords, features], axis=-1)       # (B, N, 4)
    if b_pad != B:
        data = jnp.pad(data, ((0, b_pad - B), (0, 0), (0, 0)))
    data = data.reshape(b_pad * N, 4)

    slab, rp_vec = _pack_params(params, num_classes)

    # advisory cost estimate for the XLA scheduler
    per_b_flops = (
        2 * N * 4 * DIM              # rank-1 feature_proj + fused QKV broadcasts
        + 2 * N * N * 3 + 2 * N * 3  # Gram matrix + squared-norm row
        + 4 * N * N * DIM            # q.k^T and (e*gate).v
        + 12 * N * N                 # gates / softmax elementwise work
        + 2 * N * DIM * DIM          # output projection
        + 4 * N * DIM * HID          # FFN
        + 2 * DIM * HID + 2 * HID * LANES)   # classifier head
    cost = pl.CostEstimate(
        flops=int(b_pad * per_b_flops),
        transcendentals=int(b_pad * 3 * N * N),   # 2 sigmoid + 1 exp per N^2 element
        bytes_accessed=int(4 * (b_pad * N * 4 + SLAB_ROWS * LANES
                                + rp_vec.size + b_pad * LANES)),
    )

    out_padded = pl.pallas_call(
        se3_cls_kernel,
        out_shape=jax.ShapeDtypeStruct((b_pad, LANES), jnp.float32),
        grid=(grid_b,),
        in_specs=[
            pl.BlockSpec((block_b * N, 4), lambda b: (b, 0)),          # packed data
            pl.BlockSpec((SLAB_ROWS, LANES), lambda b: (0, 0)),        # resident params
            pl.BlockSpec(memory_space=pltpu.MemorySpace.SMEM),         # radial scalars
        ],
        out_specs=pl.BlockSpec((block_b, LANES), lambda b: (b, 0)),    # lane-dense
        compiler_params=pltpu.CompilerParams(
            dimension_semantics=("parallel",),
            vmem_limit_bytes=32 * 1024 * 1024),
        cost_estimate=cost,
    )(data, slab, rp_vec)

    return out_padded[:B, :num_classes]


def init_params(key, dim=DIM, hidden=HID, num_classes=4):
    """Deterministic PyTorch-style (uniform +-1/sqrt(fan_in)) initialization."""
    def linear(k, fan_in, fan_out):
        kw, kb = jax.random.split(k)
        bound = 1.0 / math.sqrt(fan_in)
        w = jax.random.uniform(kw, (fan_in, fan_out), jnp.float32, -bound, bound)
        b = jax.random.uniform(kb, (1, fan_out), jnp.float32, -bound, bound)
        return w, b

    keys = jax.random.split(key, 10)
    params = {}
    params["wp"], params["bp"] = linear(keys[0], 1, dim)
    params["wq"], params["bq"] = linear(keys[1], dim, dim)
    params["wk"], params["bk"] = linear(keys[2], dim, dim)
    params["wv"], params["bv"] = linear(keys[3], dim, dim)
    params["wo"], params["bo"] = linear(keys[4], dim, dim)
    params["rp"] = 0.1 * jax.random.normal(keys[5], (2, 2), jnp.float32)
    params["wf1"], params["bf1"] = linear(keys[6], dim, hidden)
    params["wf2"], params["bf2"] = linear(keys[7], hidden, dim)
    params["wc1"], params["bc1"] = linear(keys[8], dim, hidden)
    params["wc2"], params["bc2"] = linear(keys[9], hidden, num_classes)
    return params


if __name__ == "__main__":
    B, N, NUM_CLASSES = 2, 8, 4

    key = jax.random.PRNGKey(0)
    k_feat, k_coord, k_param = jax.random.split(key, 3)

    features = jax.random.normal(k_feat, (B, N, 1), jnp.float32)
    coords = jax.random.normal(k_coord, (B, N, 3), jnp.float32)
    params = init_params(k_param, dim=DIM, hidden=HID, num_classes=NUM_CLASSES)

    out = se3_classification_forward(features, coords, params)
    out = jax.block_until_ready(out)
    assert out.shape == (B, NUM_CLASSES) and out.dtype == jnp.float32
    assert bool(jnp.all(jnp.isfinite(out)))
    print("KERNEL_OK")
</pallas_src>

<mosaic_0001>
module attributes {stable_mosaic.version = 11 : i64} {
  func.func @se3_cls_kernel(%arg0: i32, %arg1: memref<64x4xf32, #tpu.memory_space<vmem>>, %arg2: memref<72x128xf32, #tpu.memory_space<vmem>>, %arg3: memref<4xf32, #tpu.memory_space<smem>>, %arg4: memref<8x128xf32, #tpu.memory_space<vmem>>) attributes {dimension_semantics = [#tpu.dimension_semantics<parallel>], iteration_bounds = array<i64: 1>, scalar_prefetch = 0 : i64, scratch_operands = 0 : i64, tpu.core_type = #tpu.core_type<tc>, window_params = [{transform_indices = @transform_0, window_bounds = array<i64: 64, 4>}, {pipeline_mode = #tpu.pipeline_mode<synchronous>, transform_indices = @transform_1, window_bounds = array<i64: 72, 128>}, {transform_indices = @transform_2, window_bounds = array<i64: 4>}, {transform_indices = @transform_3, window_bounds = array<i64: 8, 128>}]} {
    %c0 = arith.constant 0 : index
    %c0_0 = arith.constant 0 : index
    %0 = vector.load %arg2[%c0, %c0_0] : memref<72x128xf32, #tpu.memory_space<vmem>>, vector<1x8xf32>
    %c1 = arith.constant 1 : index
    %c0_1 = arith.constant 0 : index
    %1 = vector.load %arg2[%c1, %c0_1] : memref<72x128xf32, #tpu.memory_space<vmem>>, vector<1x8xf32>
    %c2 = arith.constant 2 : index
    %c0_2 = arith.constant 0 : index
    %2 = vector.load %arg2[%c2, %c0_2] : memref<72x128xf32, #tpu.memory_space<vmem>>, vector<1x24xf32>
    %c3 = arith.constant 3 : index
    %c0_3 = arith.constant 0 : index
    %3 = vector.load %arg2[%c3, %c0_3] : memref<72x128xf32, #tpu.memory_space<vmem>>, vector<1x24xf32>
    %c4 = arith.constant 4 : index
    %c0_4 = arith.constant 0 : index
    %4 = vector.load %arg2[%c4, %c0_4] : memref<72x128xf32, #tpu.memory_space<vmem>>, vector<1x8xf32>
    %c5 = arith.constant 5 : index
    %c0_5 = arith.constant 0 : index
    %5 = vector.load %arg2[%c5, %c0_5] : memref<72x128xf32, #tpu.memory_space<vmem>>, vector<1x16xf32>
    %c6 = arith.constant 6 : index
    %c0_6 = arith.constant 0 : index
    %6 = vector.load %arg2[%c6, %c0_6] : memref<72x128xf32, #tpu.memory_space<vmem>>, vector<1x8xf32>
    %c7 = arith.constant 7 : index
    %c0_7 = arith.constant 0 : index
    %7 = vector.load %arg2[%c7, %c0_7] : memref<72x128xf32, #tpu.memory_space<vmem>>, vector<1x16xf32>
    %c8 = arith.constant 8 : index
    %c0_8 = arith.constant 0 : index
    %8 = vector.load %arg2[%c8, %c0_8] : memref<72x128xf32, #tpu.memory_space<vmem>>, vector<8x8xf32>
    %c16 = arith.constant 16 : index
    %c0_9 = arith.constant 0 : index
    %9 = vector.load %arg2[%c16, %c0_9] : memref<72x128xf32, #tpu.memory_space<vmem>>, vector<8x16xf32>
    %c24 = arith.constant 24 : index
    %c0_10 = arith.constant 0 : index
    %10 = vector.load %arg2[%c24, %c0_10] : memref<72x128xf32, #tpu.memory_space<vmem>>, vector<16x8xf32>
    %c40 = arith.constant 40 : index
    %c0_11 = arith.constant 0 : index
    %11 = vector.load %arg2[%c40, %c0_11] : memref<72x128xf32, #tpu.memory_space<vmem>>, vector<8x16xf32>
    %c48 = arith.constant 48 : index
    %c0_12 = arith.constant 0 : index
    %12 = vector.load %arg2[%c48, %c0_12] : memref<72x128xf32, #tpu.memory_space<vmem>>, vector<16x128xf32>
    %c64 = arith.constant 64 : index
    %c0_13 = arith.constant 0 : index
    %13 = vector.load %arg2[%c64, %c0_13] : memref<72x128xf32, #tpu.memory_space<vmem>>, vector<1x128xf32>
    %c0_14 = arith.constant 0 : index
    %14 = memref.load %arg3[%c0_14] : memref<4xf32, #tpu.memory_space<smem>>
    %c1_15 = arith.constant 1 : index
    %15 = memref.load %arg3[%c1_15] : memref<4xf32, #tpu.memory_space<smem>>
    %c2_16 = arith.constant 2 : index
    %16 = memref.load %arg3[%c2_16] : memref<4xf32, #tpu.memory_space<smem>>
    %c3_17 = arith.constant 3 : index
    %17 = memref.load %arg3[%c3_17] : memref<4xf32, #tpu.memory_space<smem>>
    %c0_18 = arith.constant 0 : index
    %c0_19 = arith.constant 0 : index
    %18 = vector.load %arg1[%c0_18, %c0_19] : memref<64x4xf32, #tpu.memory_space<vmem>>, vector<64x4xf32>
    %19 = vector.extract_strided_slice %18 {offsets = [0, 0], sizes = [64, 3], strides = [1, 1]} : vector<64x4xf32> to vector<64x3xf32>
    %20 = vector.extract_strided_slice %18 {offsets = [0, 3], sizes = [64, 1], strides = [1, 1]} : vector<64x4xf32> to vector<64x1xf32>
    %21 = vector.broadcast %20 : vector<64x1xf32> to vector<64x8xf32>
    %22 = vector.broadcast %0 : vector<1x8xf32> to vector<64x8xf32>
    %23 = arith.mulf %21, %22 : vector<64x8xf32>
    %24 = vector.broadcast %1 : vector<1x8xf32> to vector<64x8xf32>
    %25 = arith.addf %23, %24 : vector<64x8xf32>
    %26 = vector.broadcast %20 : vector<64x1xf32> to vector<64x24xf32>
    %27 = vector.broadcast %2 : vector<1x24xf32> to vector<64x24xf32>
    %28 = arith.mulf %26, %27 : vector<64x24xf32>
    %29 = vector.broadcast %3 : vector<1x24xf32> to vector<64x24xf32>
    %30 = arith.addf %28, %29 : vector<64x24xf32>
    %cst = arith.constant 1.000000e+00 : f32
    %31 = vector.broadcast %cst : f32 to vector<1x3xf32>
    %32 = vector.extract_strided_slice %19 {offsets = [0, 0], sizes = [8, 3], strides = [1, 1]} : vector<64x3xf32> to vector<8x3xf32>
    %33 = vector.extract_strided_slice %30 {offsets = [0, 0], sizes = [8, 8], strides = [1, 1]} : vector<64x24xf32> to vector<8x8xf32>
    %34 = vector.extract_strided_slice %30 {offsets = [0, 8], sizes = [8, 8], strides = [1, 1]} : vector<64x24xf32> to vector<8x8xf32>
    %35 = vector.extract_strided_slice %30 {offsets = [0, 16], sizes = [8, 8], strides = [1, 1]} : vector<64x24xf32> to vector<8x8xf32>
    %36 = arith.mulf %32, %32 : vector<8x3xf32>
    %cst_20 = arith.constant dense<0.000000e+00> : vector<8xf32>
    %37 = vector.multi_reduction <add>, %36, %cst_20 [1] : vector<8x3xf32> to vector<8xf32>
    %38 = vector.shape_cast %37 : vector<8xf32> to vector<8x1xf32>
    %cst_21 = arith.constant dense<0.000000e+00> : vector<1x8xf32>
    %39 = tpu.matmul %31, %36, %cst_21 {dimension_numbers = #tpu.dot_dimension_numbers<[1], [1], [0], [0], [0, 0, 1, 0], [], []>} : vector<1x3xf32>, vector<8x3xf32>, vector<1x8xf32> -> vector<1x8xf32>
    %cst_22 = arith.constant dense<0.000000e+00> : vector<8x8xf32>
    %40 = tpu.matmul %32, %32, %cst_22 {dimension_numbers = #tpu.dot_dimension_numbers<[1], [1], [0], [0], [0, 0, 1, 0], [], []>} : vector<8x3xf32>, vector<8x3xf32>, vector<8x8xf32> -> vector<8x8xf32>
    %41 = vector.broadcast %38 : vector<8x1xf32> to vector<8x8xf32>
    %42 = vector.broadcast %39 : vector<1x8xf32> to vector<8x8xf32>
    %43 = arith.addf %41, %42 : vector<8x8xf32>
    %cst_23 = arith.constant 2.000000e+00 : f32
    %44 = vector.broadcast %cst_23 : f32 to vector<8x8xf32>
    %45 = arith.mulf %44, %40 : vector<8x8xf32>
    %46 = arith.subf %43, %45 : vector<8x8xf32>
    %cst_24 = arith.constant 0.000000e+00 : f32
    %47 = vector.broadcast %cst_24 : f32 to vector<8x8xf32>
    %48 = arith.maximumf %46, %47 : vector<8x8xf32>
    %49 = vector.broadcast %14 : f32 to vector<8x8xf32>
    %50 = arith.mulf %48, %49 : vector<8x8xf32>
    %51 = vector.broadcast %15 : f32 to vector<8x8xf32>
    %52 = arith.addf %50, %51 : vector<8x8xf32>
    %53 = arith.negf %52 : vector<8x8xf32>
    %54 = math.exp %53 : vector<8x8xf32>
    %cst_25 = arith.constant 1.000000e+00 : f32
    %55 = vector.broadcast %cst_25 : f32 to vector<8x8xf32>
    %56 = arith.addf %55, %54 : vector<8x8xf32>
    %57 = arith.divf %55, %56 : vector<8x8xf32>
    %58 = vector.broadcast %16 : f32 to vector<8x8xf32>
    %59 = arith.mulf %48, %58 : vector<8x8xf32>
    %60 = vector.broadcast %17 : f32 to vector<8x8xf32>
    %61 = arith.addf %59, %60 : vector<8x8xf32>
    %62 = arith.negf %61 : vector<8x8xf32>
    %63 = math.exp %62 : vector<8x8xf32>
    %cst_26 = arith.constant 1.000000e+00 : f32
    %64 = vector.broadcast %cst_26 : f32 to vector<8x8xf32>
    %65 = arith.addf %64, %63 : vector<8x8xf32>
    %66 = arith.divf %64, %65 : vector<8x8xf32>
    %cst_27 = arith.constant dense<0.000000e+00> : vector<8x8xf32>
    %67 = tpu.matmul %33, %34, %cst_27 {dimension_numbers = #tpu.dot_dimension_numbers<[1], [1], [0], [0], [0, 0, 1, 0], [], []>} : vector<8x8xf32>, vector<8x8xf32>, vector<8x8xf32> -> vector<8x8xf32>
    %cst_28 = arith.constant dense<0xFF800000> : vector<8xf32>
    %68 = vector.multi_reduction <maximumf>, %67, %cst_28 [1] : vector<8x8xf32> to vector<8xf32>
    %69 = vector.shape_cast %68 : vector<8xf32> to vector<8x1xf32>
    %70 = vector.broadcast %69 : vector<8x1xf32> to vector<8x8xf32>
    %71 = arith.subf %67, %70 : vector<8x8xf32>
    %72 = math.exp %71 : vector<8x8xf32>
    %73 = arith.mulf %72, %57 : vector<8x8xf32>
    %cst_29 = arith.constant dense<0.000000e+00> : vector<8xf32>
    %74 = vector.multi_reduction <add>, %73, %cst_29 [1] : vector<8x8xf32> to vector<8xf32>
    %75 = vector.shape_cast %74 : vector<8xf32> to vector<8x1xf32>
    %cst_30 = arith.constant 9.99999968E-21 : f32
    %76 = vector.broadcast %cst_30 : f32 to vector<8x1xf32>
    %77 = arith.addf %75, %76 : vector<8x1xf32>
    %78 = arith.mulf %73, %66 : vector<8x8xf32>
    %cst_31 = arith.constant dense<0.000000e+00> : vector<8x8xf32>
    %79 = tpu.matmul %78, %35, %cst_31 {dimension_numbers = #tpu.dot_dimension_numbers<[1], [0], [0], [1], [0, 0, 1, 1], [], []>} : vector<8x8xf32>, vector<8x8xf32>, vector<8x8xf32> -> vector<8x8xf32>
    %80 = tpu.reciprocal %77 {approx = true} : vector<8x1xf32> -> vector<8x1xf32>
    %81 = vector.broadcast %80 : vector<8x1xf32> to vector<8x8xf32>
    %82 = arith.mulf %79, %81 : vector<8x8xf32>
    %83 = vector.extract_strided_slice %19 {offsets = [8, 0], sizes = [8, 3], strides = [1, 1]} : vector<64x3xf32> to vector<8x3xf32>
    %84 = vector.extract_strided_slice %30 {offsets = [8, 0], sizes = [8, 8], strides = [1, 1]} : vector<64x24xf32> to vector<8x8xf32>
    %85 = vector.extract_strided_slice %30 {offsets = [8, 8], sizes = [8, 8], strides = [1, 1]} : vector<64x24xf32> to vector<8x8xf32>
    %86 = vector.extract_strided_slice %30 {offsets = [8, 16], sizes = [8, 8], strides = [1, 1]} : vector<64x24xf32> to vector<8x8xf32>
    %87 = arith.mulf %83, %83 : vector<8x3xf32>
    %cst_32 = arith.constant dense<0.000000e+00> : vector<8xf32>
    %88 = vector.multi_reduction <add>, %87, %cst_32 [1] : vector<8x3xf32> to vector<8xf32>
    %89 = vector.shape_cast %88 : vector<8xf32> to vector<8x1xf32>
    %cst_33 = arith.constant dense<0.000000e+00> : vector<1x8xf32>
    %90 = tpu.matmul %31, %87, %cst_33 {dimension_numbers = #tpu.dot_dimension_numbers<[1], [1], [0], [0], [0, 0, 1, 0], [], []>} : vector<1x3xf32>, vector<8x3xf32>, vector<1x8xf32> -> vector<1x8xf32>
    %cst_34 = arith.constant dense<0.000000e+00> : vector<8x8xf32>
    %91 = tpu.matmul %83, %83, %cst_34 {dimension_numbers = #tpu.dot_dimension_numbers<[1], [1], [0], [0], [0, 0, 1, 0], [], []>} : vector<8x3xf32>, vector<8x3xf32>, vector<8x8xf32> -> vector<8x8xf32>
    %92 = vector.broadcast %89 : vector<8x1xf32> to vector<8x8xf32>
    %93 = vector.broadcast %90 : vector<1x8xf32> to vector<8x8xf32>
    %94 = arith.addf %92, %93 : vector<8x8xf32>
    %cst_35 = arith.constant 2.000000e+00 : f32
    %95 = vector.broadcast %cst_35 : f32 to vector<8x8xf32>
    %96 = arith.mulf %95, %91 : vector<8x8xf32>
    %97 = arith.subf %94, %96 : vector<8x8xf32>
    %cst_36 = arith.constant 0.000000e+00 : f32
    %98 = vector.broadcast %cst_36 : f32 to vector<8x8xf32>
    %99 = arith.maximumf %97, %98 : vector<8x8xf32>
    %100 = vector.broadcast %14 : f32 to vector<8x8xf32>
    %101 = arith.mulf %99, %100 : vector<8x8xf32>
    %102 = vector.broadcast %15 : f32 to vector<8x8xf32>
    %103 = arith.addf %101, %102 : vector<8x8xf32>
    %104 = arith.negf %103 : vector<8x8xf32>
    %105 = math.exp %104 : vector<8x8xf32>
    %cst_37 = arith.constant 1.000000e+00 : f32
    %106 = vector.broadcast %cst_37 : f32 to vector<8x8xf32>
    %107 = arith.addf %106, %105 : vector<8x8xf32>
    %108 = arith.divf %106, %107 : vector<8x8xf32>
    %109 = vector.broadcast %16 : f32 to vector<8x8xf32>
    %110 = arith.mulf %99, %109 : vector<8x8xf32>
    %111 = vector.broadcast %17 : f32 to vector<8x8xf32>
    %112 = arith.addf %110, %111 : vector<8x8xf32>
    %113 = arith.negf %112 : vector<8x8xf32>
    %114 = math.exp %113 : vector<8x8xf32>
    %cst_38 = arith.constant 1.000000e+00 : f32
    %115 = vector.broadcast %cst_38 : f32 to vector<8x8xf32>
    %116 = arith.addf %115, %114 : vector<8x8xf32>
    %117 = arith.divf %115, %116 : vector<8x8xf32>
    %cst_39 = arith.constant dense<0.000000e+00> : vector<8x8xf32>
    %118 = tpu.matmul %84, %85, %cst_39 {dimension_numbers = #tpu.dot_dimension_numbers<[1], [1], [0], [0], [0, 0, 1, 0], [], []>} : vector<8x8xf32>, vector<8x8xf32>, vector<8x8xf32> -> vector<8x8xf32>
    %cst_40 = arith.constant dense<0xFF800000> : vector<8xf32>
    %119 = vector.multi_reduction <maximumf>, %118, %cst_40 [1] : vector<8x8xf32> to vector<8xf32>
    %120 = vector.shape_cast %119 : vector<8xf32> to vector<8x1xf32>
    %121 = vector.broadcast %120 : vector<8x1xf32> to vector<8x8xf32>
    %122 = arith.subf %118, %121 : vector<8x8xf32>
    %123 = math.exp %122 : vector<8x8xf32>
    %124 = arith.mulf %123, %108 : vector<8x8xf32>
    %cst_41 = arith.constant dense<0.000000e+00> : vector<8xf32>
    %125 = vector.multi_reduction <add>, %124, %cst_41 [1] : vector<8x8xf32> to vector<8xf32>
    %126 = vector.shape_cast %125 : vector<8xf32> to vector<8x1xf32>
    %cst_42 = arith.constant 9.99999968E-21 : f32
    %127 = vector.broadcast %cst_42 : f32 to vector<8x1xf32>
    %128 = arith.addf %126, %127 : vector<8x1xf32>
    %129 = arith.mulf %124, %117 : vector<8x8xf32>
    %cst_43 = arith.constant dense<0.000000e+00> : vector<8x8xf32>
    %130 = tpu.matmul %129, %86, %cst_43 {dimension_numbers = #tpu.dot_dimension_numbers<[1], [0], [0], [1], [0, 0, 1, 1], [], []>} : vector<8x8xf32>, vector<8x8xf32>, vector<8x8xf32> -> vector<8x8xf32>
    %131 = tpu.reciprocal %128 {approx = true} : vector<8x1xf32> -> vector<8x1xf32>
    %132 = vector.broadcast %131 : vector<8x1xf32> to vector<8x8xf32>
    %133 = arith.mulf %130, %132 : vector<8x8xf32>
    %134 = vector.extract_strided_slice %19 {offsets = [16, 0], sizes = [8, 3], strides = [1, 1]} : vector<64x3xf32> to vector<8x3xf32>
    %135 = vector.extract_strided_slice %30 {offsets = [16, 0], sizes = [8, 8], strides = [1, 1]} : vector<64x24xf32> to vector<8x8xf32>
    %136 = vector.extract_strided_slice %30 {offsets = [16, 8], sizes = [8, 8], strides = [1, 1]} : vector<64x24xf32> to vector<8x8xf32>
    %137 = vector.extract_strided_slice %30 {offsets = [16, 16], sizes = [8, 8], strides = [1, 1]} : vector<64x24xf32> to vector<8x8xf32>
    %138 = arith.mulf %134, %134 : vector<8x3xf32>
    %cst_44 = arith.constant dense<0.000000e+00> : vector<8xf32>
    %139 = vector.multi_reduction <add>, %138, %cst_44 [1] : vector<8x3xf32> to vector<8xf32>
    %140 = vector.shape_cast %139 : vector<8xf32> to vector<8x1xf32>
    %cst_45 = arith.constant dense<0.000000e+00> : vector<1x8xf32>
    %141 = tpu.matmul %31, %138, %cst_45 {dimension_numbers = #tpu.dot_dimension_numbers<[1], [1], [0], [0], [0, 0, 1, 0], [], []>} : vector<1x3xf32>, vector<8x3xf32>, vector<1x8xf32> -> vector<1x8xf32>
    %cst_46 = arith.constant dense<0.000000e+00> : vector<8x8xf32>
    %142 = tpu.matmul %134, %134, %cst_46 {dimension_numbers = #tpu.dot_dimension_numbers<[1], [1], [0], [0], [0, 0, 1, 0], [], []>} : vector<8x3xf32>, vector<8x3xf32>, vector<8x8xf32> -> vector<8x8xf32>
    %143 = vector.broadcast %140 : vector<8x1xf32> to vector<8x8xf32>
    %144 = vector.broadcast %141 : vector<1x8xf32> to vector<8x8xf32>
    %145 = arith.addf %143, %144 : vector<8x8xf32>
    %cst_47 = arith.constant 2.000000e+00 : f32
    %146 = vector.broadcast %cst_47 : f32 to vector<8x8xf32>
    %147 = arith.mulf %146, %142 : vector<8x8xf32>
    %148 = arith.subf %145, %147 : vector<8x8xf32>
    %cst_48 = arith.constant 0.000000e+00 : f32
    %149 = vector.broadcast %cst_48 : f32 to vector<8x8xf32>
    %150 = arith.maximumf %148, %149 : vector<8x8xf32>
    %151 = vector.broadcast %14 : f32 to vector<8x8xf32>
    %152 = arith.mulf %150, %151 : vector<8x8xf32>
    %153 = vector.broadcast %15 : f32 to vector<8x8xf32>
    %154 = arith.addf %152, %153 : vector<8x8xf32>
    %155 = arith.negf %154 : vector<8x8xf32>
    %156 = math.exp %155 : vector<8x8xf32>
    %cst_49 = arith.constant 1.000000e+00 : f32
    %157 = vector.broadcast %cst_49 : f32 to vector<8x8xf32>
    %158 = arith.addf %157, %156 : vector<8x8xf32>
    %159 = arith.divf %157, %158 : vector<8x8xf32>
    %160 = vector.broadcast %16 : f32 to vector<8x8xf32>
    %161 = arith.mulf %150, %160 : vector<8x8xf32>
    %162 = vector.broadcast %17 : f32 to vector<8x8xf32>
    %163 = arith.addf %161, %162 : vector<8x8xf32>
    %164 = arith.negf %163 : vector<8x8xf32>
    %165 = math.exp %164 : vector<8x8xf32>
    %cst_50 = arith.constant 1.000000e+00 : f32
    %166 = vector.broadcast %cst_50 : f32 to vector<8x8xf32>
    %167 = arith.addf %166, %165 : vector<8x8xf32>
    %168 = arith.divf %166, %167 : vector<8x8xf32>
    %cst_51 = arith.constant dense<0.000000e+00> : vector<8x8xf32>
    %169 = tpu.matmul %135, %136, %cst_51 {dimension_numbers = #tpu.dot_dimension_numbers<[1], [1], [0], [0], [0, 0, 1, 0], [], []>} : vector<8x8xf32>, vector<8x8xf32>, vector<8x8xf32> -> vector<8x8xf32>
    %cst_52 = arith.constant dense<0xFF800000> : vector<8xf32>
    %170 = vector.multi_reduction <maximumf>, %169, %cst_52 [1] : vector<8x8xf32> to vector<8xf32>
    %171 = vector.shape_cast %170 : vector<8xf32> to vector<8x1xf32>
    %172 = vector.broadcast %171 : vector<8x1xf32> to vector<8x8xf32>
    %173 = arith.subf %169, %172 : vector<8x8xf32>
    %174 = math.exp %173 : vector<8x8xf32>
    %175 = arith.mulf %174, %159 : vector<8x8xf32>
    %cst_53 = arith.constant dense<0.000000e+00> : vector<8xf32>
    %176 = vector.multi_reduction <add>, %175, %cst_53 [1] : vector<8x8xf32> to vector<8xf32>
    %177 = vector.shape_cast %176 : vector<8xf32> to vector<8x1xf32>
    %cst_54 = arith.constant 9.99999968E-21 : f32
    %178 = vector.broadcast %cst_54 : f32 to vector<8x1xf32>
    %179 = arith.addf %177, %178 : vector<8x1xf32>
    %180 = arith.mulf %175, %168 : vector<8x8xf32>
    %cst_55 = arith.constant dense<0.000000e+00> : vector<8x8xf32>
    %181 = tpu.matmul %180, %137, %cst_55 {dimension_numbers = #tpu.dot_dimension_numbers<[1], [0], [0], [1], [0, 0, 1, 1], [], []>} : vector<8x8xf32>, vector<8x8xf32>, vector<8x8xf32> -> vector<8x8xf32>
    %182 = tpu.reciprocal %179 {approx = true} : vector<8x1xf32> -> vector<8x1xf32>
    %183 = vector.broadcast %182 : vector<8x1xf32> to vector<8x8xf32>
    %184 = arith.mulf %181, %183 : vector<8x8xf32>
    %185 = vector.extract_strided_slice %19 {offsets = [24, 0], sizes = [8, 3], strides = [1, 1]} : vector<64x3xf32> to vector<8x3xf32>
    %186 = vector.extract_strided_slice %30 {offsets = [24, 0], sizes = [8, 8], strides = [1, 1]} : vector<64x24xf32> to vector<8x8xf32>
    %187 = vector.extract_strided_slice %30 {offsets = [24, 8], sizes = [8, 8], strides = [1, 1]} : vector<64x24xf32> to vector<8x8xf32>
    %188 = vector.extract_strided_slice %30 {offsets = [24, 16], sizes = [8, 8], strides = [1, 1]} : vector<64x24xf32> to vector<8x8xf32>
    %189 = arith.mulf %185, %185 : vector<8x3xf32>
    %cst_56 = arith.constant dense<0.000000e+00> : vector<8xf32>
    %190 = vector.multi_reduction <add>, %189, %cst_56 [1] : vector<8x3xf32> to vector<8xf32>
    %191 = vector.shape_cast %190 : vector<8xf32> to vector<8x1xf32>
    %cst_57 = arith.constant dense<0.000000e+00> : vector<1x8xf32>
    %192 = tpu.matmul %31, %189, %cst_57 {dimension_numbers = #tpu.dot_dimension_numbers<[1], [1], [0], [0], [0, 0, 1, 0], [], []>} : vector<1x3xf32>, vector<8x3xf32>, vector<1x8xf32> -> vector<1x8xf32>
    %cst_58 = arith.constant dense<0.000000e+00> : vector<8x8xf32>
    %193 = tpu.matmul %185, %185, %cst_58 {dimension_numbers = #tpu.dot_dimension_numbers<[1], [1], [0], [0], [0, 0, 1, 0], [], []>} : vector<8x3xf32>, vector<8x3xf32>, vector<8x8xf32> -> vector<8x8xf32>
    %194 = vector.broadcast %191 : vector<8x1xf32> to vector<8x8xf32>
    %195 = vector.broadcast %192 : vector<1x8xf32> to vector<8x8xf32>
    %196 = arith.addf %194, %195 : vector<8x8xf32>
    %cst_59 = arith.constant 2.000000e+00 : f32
    %197 = vector.broadcast %cst_59 : f32 to vector<8x8xf32>
    %198 = arith.mulf %197, %193 : vector<8x8xf32>
    %199 = arith.subf %196, %198 : vector<8x8xf32>
    %cst_60 = arith.constant 0.000000e+00 : f32
    %200 = vector.broadcast %cst_60 : f32 to vector<8x8xf32>
    %201 = arith.maximumf %199, %200 : vector<8x8xf32>
    %202 = vector.broadcast %14 : f32 to vector<8x8xf32>
    %203 = arith.mulf %201, %202 : vector<8x8xf32>
    %204 = vector.broadcast %15 : f32 to vector<8x8xf32>
    %205 = arith.addf %203, %204 : vector<8x8xf32>
    %206 = arith.negf %205 : vector<8x8xf32>
    %207 = math.exp %206 : vector<8x8xf32>
    %cst_61 = arith.constant 1.000000e+00 : f32
    %208 = vector.broadcast %cst_61 : f32 to vector<8x8xf32>
    %209 = arith.addf %208, %207 : vector<8x8xf32>
    %210 = arith.divf %208, %209 : vector<8x8xf32>
    %211 = vector.broadcast %16 : f32 to vector<8x8xf32>
    %212 = arith.mulf %201, %211 : vector<8x8xf32>
    %213 = vector.broadcast %17 : f32 to vector<8x8xf32>
    %214 = arith.addf %212, %213 : vector<8x8xf32>
    %215 = arith.negf %214 : vector<8x8xf32>
    %216 = math.exp %215 : vector<8x8xf32>
    %cst_62 = arith.constant 1.000000e+00 : f32
    %217 = vector.broadcast %cst_62 : f32 to vector<8x8xf32>
    %218 = arith.addf %217, %216 : vector<8x8xf32>
    %219 = arith.divf %217, %218 : vector<8x8xf32>
    %cst_63 = arith.constant dense<0.000000e+00> : vector<8x8xf32>
    %220 = tpu.matmul %186, %187, %cst_63 {dimension_numbers = #tpu.dot_dimension_numbers<[1], [1], [0], [0], [0, 0, 1, 0], [], []>} : vector<8x8xf32>, vector<8x8xf32>, vector<8x8xf32> -> vector<8x8xf32>
    %cst_64 = arith.constant dense<0xFF800000> : vector<8xf32>
    %221 = vector.multi_reduction <maximumf>, %220, %cst_64 [1] : vector<8x8xf32> to vector<8xf32>
    %222 = vector.shape_cast %221 : vector<8xf32> to vector<8x1xf32>
    %223 = vector.broadcast %222 : vector<8x1xf32> to vector<8x8xf32>
    %224 = arith.subf %220, %223 : vector<8x8xf32>
    %225 = math.exp %224 : vector<8x8xf32>
    %226 = arith.mulf %225, %210 : vector<8x8xf32>
    %cst_65 = arith.constant dense<0.000000e+00> : vector<8xf32>
    %227 = vector.multi_reduction <add>, %226, %cst_65 [1] : vector<8x8xf32> to vector<8xf32>
    %228 = vector.shape_cast %227 : vector<8xf32> to vector<8x1xf32>
    %cst_66 = arith.constant 9.99999968E-21 : f32
    %229 = vector.broadcast %cst_66 : f32 to vector<8x1xf32>
    %230 = arith.addf %228, %229 : vector<8x1xf32>
    %231 = arith.mulf %226, %219 : vector<8x8xf32>
    %cst_67 = arith.constant dense<0.000000e+00> : vector<8x8xf32>
    %232 = tpu.matmul %231, %188, %cst_67 {dimension_numbers = #tpu.dot_dimension_numbers<[1], [0], [0], [1], [0, 0, 1, 1], [], []>} : vector<8x8xf32>, vector<8x8xf32>, vector<8x8xf32> -> vector<8x8xf32>
    %233 = tpu.reciprocal %230 {approx = true} : vector<8x1xf32> -> vector<8x1xf32>
    %234 = vector.broadcast %233 : vector<8x1xf32> to vector<8x8xf32>
    %235 = arith.mulf %232, %234 : vector<8x8xf32>
    %236 = vector.extract_strided_slice %19 {offsets = [32, 0], sizes = [8, 3], strides = [1, 1]} : vector<64x3xf32> to vector<8x3xf32>
    %237 = vector.extract_strided_slice %30 {offsets = [32, 0], sizes = [8, 8], strides = [1, 1]} : vector<64x24xf32> to vector<8x8xf32>
    %238 = vector.extract_strided_slice %30 {offsets = [32, 8], sizes = [8, 8], strides = [1, 1]} : vector<64x24xf32> to vector<8x8xf32>
    %239 = vector.extract_strided_slice %30 {offsets = [32, 16], sizes = [8, 8], strides = [1, 1]} : vector<64x24xf32> to vector<8x8xf32>
    %240 = arith.mulf %236, %236 : vector<8x3xf32>
    %cst_68 = arith.constant dense<0.000000e+00> : vector<8xf32>
    %241 = vector.multi_reduction <add>, %240, %cst_68 [1] : vector<8x3xf32> to vector<8xf32>
    %242 = vector.shape_cast %241 : vector<8xf32> to vector<8x1xf32>
    %cst_69 = arith.constant dense<0.000000e+00> : vector<1x8xf32>
    %243 = tpu.matmul %31, %240, %cst_69 {dimension_numbers = #tpu.dot_dimension_numbers<[1], [1], [0], [0], [0, 0, 1, 0], [], []>} : vector<1x3xf32>, vector<8x3xf32>, vector<1x8xf32> -> vector<1x8xf32>
    %cst_70 = arith.constant dense<0.000000e+00> : vector<8x8xf32>
    %244 = tpu.matmul %236, %236, %cst_70 {dimension_numbers = #tpu.dot_dimension_numbers<[1], [1], [0], [0], [0, 0, 1, 0], [], []>} : vector<8x3xf32>, vector<8x3xf32>, vector<8x8xf32> -> vector<8x8xf32>
    %245 = vector.broadcast %242 : vector<8x1xf32> to vector<8x8xf32>
    %246 = vector.broadcast %243 : vector<1x8xf32> to vector<8x8xf32>
    %247 = arith.addf %245, %246 : vector<8x8xf32>
    %cst_71 = arith.constant 2.000000e+00 : f32
    %248 = vector.broadcast %cst_71 : f32 to vector<8x8xf32>
    %249 = arith.mulf %248, %244 : vector<8x8xf32>
    %250 = arith.subf %247, %249 : vector<8x8xf32>
    %cst_72 = arith.constant 0.000000e+00 : f32
    %251 = vector.broadcast %cst_72 : f32 to vector<8x8xf32>
    %252 = arith.maximumf %250, %251 : vector<8x8xf32>
    %253 = vector.broadcast %14 : f32 to vector<8x8xf32>
    %254 = arith.mulf %252, %253 : vector<8x8xf32>
    %255 = vector.broadcast %15 : f32 to vector<8x8xf32>
    %256 = arith.addf %254, %255 : vector<8x8xf32>
    %257 = arith.negf %256 : vector<8x8xf32>
    %258 = math.exp %257 : vector<8x8xf32>
    %cst_73 = arith.constant 1.000000e+00 : f32
    %259 = vector.broadcast %cst_73 : f32 to vector<8x8xf32>
    %260 = arith.addf %259, %258 : vector<8x8xf32>
    %261 = arith.divf %259, %260 : vector<8x8xf32>
    %262 = vector.broadcast %16 : f32 to vector<8x8xf32>
    %263 = arith.mulf %252, %262 : vector<8x8xf32>
    %264 = vector.broadcast %17 : f32 to vector<8x8xf32>
    %265 = arith.addf %263, %264 : vector<8x8xf32>
    %266 = arith.negf %265 : vector<8x8xf32>
    %267 = math.exp %266 : vector<8x8xf32>
    %cst_74 = arith.constant 1.000000e+00 : f32
    %268 = vector.broadcast %cst_74 : f32 to vector<8x8xf32>
    %269 = arith.addf %268, %267 : vector<8x8xf32>
    %270 = arith.divf %268, %269 : vector<8x8xf32>
    %cst_75 = arith.constant dense<0.000000e+00> : vector<8x8xf32>
    %271 = tpu.matmul %237, %238, %cst_75 {dimension_numbers = #tpu.dot_dimension_numbers<[1], [1], [0], [0], [0, 0, 1, 0], [], []>} : vector<8x8xf32>, vector<8x8xf32>, vector<8x8xf32> -> vector<8x8xf32>
    %cst_76 = arith.constant dense<0xFF800000> : vector<8xf32>
    %272 = vector.multi_reduction <maximumf>, %271, %cst_76 [1] : vector<8x8xf32> to vector<8xf32>
    %273 = vector.shape_cast %272 : vector<8xf32> to vector<8x1xf32>
    %274 = vector.broadcast %273 : vector<8x1xf32> to vector<8x8xf32>
    %275 = arith.subf %271, %274 : vector<8x8xf32>
    %276 = math.exp %275 : vector<8x8xf32>
    %277 = arith.mulf %276, %261 : vector<8x8xf32>
    %cst_77 = arith.constant dense<0.000000e+00> : vector<8xf32>
    %278 = vector.multi_reduction <add>, %277, %cst_77 [1] : vector<8x8xf32> to vector<8xf32>
    %279 = vector.shape_cast %278 : vector<8xf32> to vector<8x1xf32>
    %cst_78 = arith.constant 9.99999968E-21 : f32
    %280 = vector.broadcast %cst_78 : f32 to vector<8x1xf32>
    %281 = arith.addf %279, %280 : vector<8x1xf32>
    %282 = arith.mulf %277, %270 : vector<8x8xf32>
    %cst_79 = arith.constant dense<0.000000e+00> : vector<8x8xf32>
    %283 = tpu.matmul %282, %239, %cst_79 {dimension_numbers = #tpu.dot_dimension_numbers<[1], [0], [0], [1], [0, 0, 1, 1], [], []>} : vector<8x8xf32>, vector<8x8xf32>, vector<8x8xf32> -> vector<8x8xf32>
    %284 = tpu.reciprocal %281 {approx = true} : vector<8x1xf32> -> vector<8x1xf32>
    %285 = vector.broadcast %284 : vector<8x1xf32> to vector<8x8xf32>
    %286 = arith.mulf %283, %285 : vector<8x8xf32>
    %287 = vector.extract_strided_slice %19 {offsets = [40, 0], sizes = [8, 3], strides = [1, 1]} : vector<64x3xf32> to vector<8x3xf32>
    %288 = vector.extract_strided_slice %30 {offsets = [40, 0], sizes = [8, 8], strides = [1, 1]} : vector<64x24xf32> to vector<8x8xf32>
    %289 = vector.extract_strided_slice %30 {offsets = [40, 8], sizes = [8, 8], strides = [1, 1]} : vector<64x24xf32> to vector<8x8xf32>
    %290 = vector.extract_strided_slice %30 {offsets = [40, 16], sizes = [8, 8], strides = [1, 1]} : vector<64x24xf32> to vector<8x8xf32>
    %291 = arith.mulf %287, %287 : vector<8x3xf32>
    %cst_80 = arith.constant dense<0.000000e+00> : vector<8xf32>
    %292 = vector.multi_reduction <add>, %291, %cst_80 [1] : vector<8x3xf32> to vector<8xf32>
    %293 = vector.shape_cast %292 : vector<8xf32> to vector<8x1xf32>
    %cst_81 = arith.constant dense<0.000000e+00> : vector<1x8xf32>
    %294 = tpu.matmul %31, %291, %cst_81 {dimension_numbers = #tpu.dot_dimension_numbers<[1], [1], [0], [0], [0, 0, 1, 0], [], []>} : vector<1x3xf32>, vector<8x3xf32>, vector<1x8xf32> -> vector<1x8xf32>
    %cst_82 = arith.constant dense<0.000000e+00> : vector<8x8xf32>
    %295 = tpu.matmul %287, %287, %cst_82 {dimension_numbers = #tpu.dot_dimension_numbers<[1], [1], [0], [0], [0, 0, 1, 0], [], []>} : vector<8x3xf32>, vector<8x3xf32>, vector<8x8xf32> -> vector<8x8xf32>
    %296 = vector.broadcast %293 : vector<8x1xf32> to vector<8x8xf32>
    %297 = vector.broadcast %294 : vector<1x8xf32> to vector<8x8xf32>
    %298 = arith.addf %296, %297 : vector<8x8xf32>
    %cst_83 = arith.constant 2.000000e+00 : f32
    %299 = vector.broadcast %cst_83 : f32 to vector<8x8xf32>
    %300 = arith.mulf %299, %295 : vector<8x8xf32>
    %301 = arith.subf %298, %300 : vector<8x8xf32>
    %cst_84 = arith.constant 0.000000e+00 : f32
    %302 = vector.broadcast %cst_84 : f32 to vector<8x8xf32>
    %303 = arith.maximumf %301, %302 : vector<8x8xf32>
    %304 = vector.broadcast %14 : f32 to vector<8x8xf32>
    %305 = arith.mulf %303, %304 : vector<8x8xf32>
    %306 = vector.broadcast %15 : f32 to vector<8x8xf32>
    %307 = arith.addf %305, %306 : vector<8x8xf32>
    %308 = arith.negf %307 : vector<8x8xf32>
    %309 = math.exp %308 : vector<8x8xf32>
    %cst_85 = arith.constant 1.000000e+00 : f32
    %310 = vector.broadcast %cst_85 : f32 to vector<8x8xf32>
    %311 = arith.addf %310, %309 : vector<8x8xf32>
    %312 = arith.divf %310, %311 : vector<8x8xf32>
    %313 = vector.broadcast %16 : f32 to vector<8x8xf32>
    %314 = arith.mulf %303, %313 : vector<8x8xf32>
    %315 = vector.broadcast %17 : f32 to vector<8x8xf32>
    %316 = arith.addf %314, %315 : vector<8x8xf32>
    %317 = arith.negf %316 : vector<8x8xf32>
    %318 = math.exp %317 : vector<8x8xf32>
    %cst_86 = arith.constant 1.000000e+00 : f32
    %319 = vector.broadcast %cst_86 : f32 to vector<8x8xf32>
    %320 = arith.addf %319, %318 : vector<8x8xf32>
    %321 = arith.divf %319, %320 : vector<8x8xf32>
    %cst_87 = arith.constant dense<0.000000e+00> : vector<8x8xf32>
    %322 = tpu.matmul %288, %289, %cst_87 {dimension_numbers = #tpu.dot_dimension_numbers<[1], [1], [0], [0], [0, 0, 1, 0], [], []>} : vector<8x8xf32>, vector<8x8xf32>, vector<8x8xf32> -> vector<8x8xf32>
    %cst_88 = arith.constant dense<0xFF800000> : vector<8xf32>
    %323 = vector.multi_reduction <maximumf>, %322, %cst_88 [1] : vector<8x8xf32> to vector<8xf32>
    %324 = vector.shape_cast %323 : vector<8xf32> to vector<8x1xf32>
    %325 = vector.broadcast %324 : vector<8x1xf32> to vector<8x8xf32>
    %326 = arith.subf %322, %325 : vector<8x8xf32>
    %327 = math.exp %326 : vector<8x8xf32>
    %328 = arith.mulf %327, %312 : vector<8x8xf32>
    %cst_89 = arith.constant dense<0.000000e+00> : vector<8xf32>
    %329 = vector.multi_reduction <add>, %328, %cst_89 [1] : vector<8x8xf32> to vector<8xf32>
    %330 = vector.shape_cast %329 : vector<8xf32> to vector<8x1xf32>
    %cst_90 = arith.constant 9.99999968E-21 : f32
    %331 = vector.broadcast %cst_90 : f32 to vector<8x1xf32>
    %332 = arith.addf %330, %331 : vector<8x1xf32>
    %333 = arith.mulf %328, %321 : vector<8x8xf32>
    %cst_91 = arith.constant dense<0.000000e+00> : vector<8x8xf32>
    %334 = tpu.matmul %333, %290, %cst_91 {dimension_numbers = #tpu.dot_dimension_numbers<[1], [0], [0], [1], [0, 0, 1, 1], [], []>} : vector<8x8xf32>, vector<8x8xf32>, vector<8x8xf32> -> vector<8x8xf32>
    %335 = tpu.reciprocal %332 {approx = true} : vector<8x1xf32> -> vector<8x1xf32>
    %336 = vector.broadcast %335 : vector<8x1xf32> to vector<8x8xf32>
    %337 = arith.mulf %334, %336 : vector<8x8xf32>
    %338 = vector.extract_strided_slice %19 {offsets = [48, 0], sizes = [8, 3], strides = [1, 1]} : vector<64x3xf32> to vector<8x3xf32>
    %339 = vector.extract_strided_slice %30 {offsets = [48, 0], sizes = [8, 8], strides = [1, 1]} : vector<64x24xf32> to vector<8x8xf32>
    %340 = vector.extract_strided_slice %30 {offsets = [48, 8], sizes = [8, 8], strides = [1, 1]} : vector<64x24xf32> to vector<8x8xf32>
    %341 = vector.extract_strided_slice %30 {offsets = [48, 16], sizes = [8, 8], strides = [1, 1]} : vector<64x24xf32> to vector<8x8xf32>
    %342 = arith.mulf %338, %338 : vector<8x3xf32>
    %cst_92 = arith.constant dense<0.000000e+00> : vector<8xf32>
    %343 = vector.multi_reduction <add>, %342, %cst_92 [1] : vector<8x3xf32> to vector<8xf32>
    %344 = vector.shape_cast %343 : vector<8xf32> to vector<8x1xf32>
    %cst_93 = arith.constant dense<0.000000e+00> : vector<1x8xf32>
    %345 = tpu.matmul %31, %342, %cst_93 {dimension_numbers = #tpu.dot_dimension_numbers<[1], [1], [0], [0], [0, 0, 1, 0], [], []>} : vector<1x3xf32>, vector<8x3xf32>, vector<1x8xf32> -> vector<1x8xf32>
    %cst_94 = arith.constant dense<0.000000e+00> : vector<8x8xf32>
    %346 = tpu.matmul %338, %338, %cst_94 {dimension_numbers = #tpu.dot_dimension_numbers<[1], [1], [0], [0], [0, 0, 1, 0], [], []>} : vector<8x3xf32>, vector<8x3xf32>, vector<8x8xf32> -> vector<8x8xf32>
    %347 = vector.broadcast %344 : vector<8x1xf32> to vector<8x8xf32>
    %348 = vector.broadcast %345 : vector<1x8xf32> to vector<8x8xf32>
    %349 = arith.addf %347, %348 : vector<8x8xf32>
    %cst_95 = arith.constant 2.000000e+00 : f32
    %350 = vector.broadcast %cst_95 : f32 to vector<8x8xf32>
    %351 = arith.mulf %350, %346 : vector<8x8xf32>
    %352 = arith.subf %349, %351 : vector<8x8xf32>
    %cst_96 = arith.constant 0.000000e+00 : f32
    %353 = vector.broadcast %cst_96 : f32 to vector<8x8xf32>
    %354 = arith.maximumf %352, %353 : vector<8x8xf32>
    %355 = vector.broadcast %14 : f32 to vector<8x8xf32>
    %356 = arith.mulf %354, %355 : vector<8x8xf32>
    %357 = vector.broadcast %15 : f32 to vector<8x8xf32>
    %358 = arith.addf %356, %357 : vector<8x8xf32>
    %359 = arith.negf %358 : vector<8x8xf32>
    %360 = math.exp %359 : vector<8x8xf32>
    %cst_97 = arith.constant 1.000000e+00 : f32
    %361 = vector.broadcast %cst_97 : f32 to vector<8x8xf32>
    %362 = arith.addf %361, %360 : vector<8x8xf32>
    %363 = arith.divf %361, %362 : vector<8x8xf32>
    %364 = vector.broadcast %16 : f32 to vector<8x8xf32>
    %365 = arith.mulf %354, %364 : vector<8x8xf32>
    %366 = vector.broadcast %17 : f32 to vector<8x8xf32>
    %367 = arith.addf %365, %366 : vector<8x8xf32>
    %368 = arith.negf %367 : vector<8x8xf32>
    %369 = math.exp %368 : vector<8x8xf32>
    %cst_98 = arith.constant 1.000000e+00 : f32
    %370 = vector.broadcast %cst_98 : f32 to vector<8x8xf32>
    %371 = arith.addf %370, %369 : vector<8x8xf32>
    %372 = arith.divf %370, %371 : vector<8x8xf32>
    %cst_99 = arith.constant dense<0.000000e+00> : vector<8x8xf32>
    %373 = tpu.matmul %339, %340, %cst_99 {dimension_numbers = #tpu.dot_dimension_numbers<[1], [1], [0], [0], [0, 0, 1, 0], [], []>} : vector<8x8xf32>, vector<8x8xf32>, vector<8x8xf32> -> vector<8x8xf32>
    %cst_100 = arith.constant dense<0xFF800000> : vector<8xf32>
    %374 = vector.multi_reduction <maximumf>, %373, %cst_100 [1] : vector<8x8xf32> to vector<8xf32>
    %375 = vector.shape_cast %374 : vector<8xf32> to vector<8x1xf32>
    %376 = vector.broadcast %375 : vector<8x1xf32> to vector<8x8xf32>
    %377 = arith.subf %373, %376 : vector<8x8xf32>
    %378 = math.exp %377 : vector<8x8xf32>
    %379 = arith.mulf %378, %363 : vector<8x8xf32>
    %cst_101 = arith.constant dense<0.000000e+00> : vector<8xf32>
    %380 = vector.multi_reduction <add>, %379, %cst_101 [1] : vector<8x8xf32> to vector<8xf32>
    %381 = vector.shape_cast %380 : vector<8xf32> to vector<8x1xf32>
    %cst_102 = arith.constant 9.99999968E-21 : f32
    %382 = vector.broadcast %cst_102 : f32 to vector<8x1xf32>
    %383 = arith.addf %381, %382 : vector<8x1xf32>
    %384 = arith.mulf %379, %372 : vector<8x8xf32>
    %cst_103 = arith.constant dense<0.000000e+00> : vector<8x8xf32>
    %385 = tpu.matmul %384, %341, %cst_103 {dimension_numbers = #tpu.dot_dimension_numbers<[1], [0], [0], [1], [0, 0, 1, 1], [], []>} : vector<8x8xf32>, vector<8x8xf32>, vector<8x8xf32> -> vector<8x8xf32>
    %386 = tpu.reciprocal %383 {approx = true} : vector<8x1xf32> -> vector<8x1xf32>
    %387 = vector.broadcast %386 : vector<8x1xf32> to vector<8x8xf32>
    %388 = arith.mulf %385, %387 : vector<8x8xf32>
    %389 = vector.extract_strided_slice %19 {offsets = [56, 0], sizes = [8, 3], strides = [1, 1]} : vector<64x3xf32> to vector<8x3xf32>
    %390 = vector.extract_strided_slice %30 {offsets = [56, 0], sizes = [8, 8], strides = [1, 1]} : vector<64x24xf32> to vector<8x8xf32>
    %391 = vector.extract_strided_slice %30 {offsets = [56, 8], sizes = [8, 8], strides = [1, 1]} : vector<64x24xf32> to vector<8x8xf32>
    %392 = vector.extract_strided_slice %30 {offsets = [56, 16], sizes = [8, 8], strides = [1, 1]} : vector<64x24xf32> to vector<8x8xf32>
    %393 = arith.mulf %389, %389 : vector<8x3xf32>
    %cst_104 = arith.constant dense<0.000000e+00> : vector<8xf32>
    %394 = vector.multi_reduction <add>, %393, %cst_104 [1] : vector<8x3xf32> to vector<8xf32>
    %395 = vector.shape_cast %394 : vector<8xf32> to vector<8x1xf32>
    %cst_105 = arith.constant dense<0.000000e+00> : vector<1x8xf32>
    %396 = tpu.matmul %31, %393, %cst_105 {dimension_numbers = #tpu.dot_dimension_numbers<[1], [1], [0], [0], [0, 0, 1, 0], [], []>} : vector<1x3xf32>, vector<8x3xf32>, vector<1x8xf32> -> vector<1x8xf32>
    %cst_106 = arith.constant dense<0.000000e+00> : vector<8x8xf32>
    %397 = tpu.matmul %389, %389, %cst_106 {dimension_numbers = #tpu.dot_dimension_numbers<[1], [1], [0], [0], [0, 0, 1, 0], [], []>} : vector<8x3xf32>, vector<8x3xf32>, vector<8x8xf32> -> vector<8x8xf32>
    %398 = vector.broadcast %395 : vector<8x1xf32> to vector<8x8xf32>
    %399 = vector.broadcast %396 : vector<1x8xf32> to vector<8x8xf32>
    %400 = arith.addf %398, %399 : vector<8x8xf32>
    %cst_107 = arith.constant 2.000000e+00 : f32
    %401 = vector.broadcast %cst_107 : f32 to vector<8x8xf32>
    %402 = arith.mulf %401, %397 : vector<8x8xf32>
    %403 = arith.subf %400, %402 : vector<8x8xf32>
    %cst_108 = arith.constant 0.000000e+00 : f32
    %404 = vector.broadcast %cst_108 : f32 to vector<8x8xf32>
    %405 = arith.maximumf %403, %404 : vector<8x8xf32>
    %406 = vector.broadcast %14 : f32 to vector<8x8xf32>
    %407 = arith.mulf %405, %406 : vector<8x8xf32>
    %408 = vector.broadcast %15 : f32 to vector<8x8xf32>
    %409 = arith.addf %407, %408 : vector<8x8xf32>
    %410 = arith.negf %409 : vector<8x8xf32>
    %411 = math.exp %410 : vector<8x8xf32>
    %cst_109 = arith.constant 1.000000e+00 : f32
    %412 = vector.broadcast %cst_109 : f32 to vector<8x8xf32>
    %413 = arith.addf %412, %411 : vector<8x8xf32>
    %414 = arith.divf %412, %413 : vector<8x8xf32>
    %415 = vector.broadcast %16 : f32 to vector<8x8xf32>
    %416 = arith.mulf %405, %415 : vector<8x8xf32>
    %417 = vector.broadcast %17 : f32 to vector<8x8xf32>
    %418 = arith.addf %416, %417 : vector<8x8xf32>
    %419 = arith.negf %418 : vector<8x8xf32>
    %420 = math.exp %419 : vector<8x8xf32>
    %cst_110 = arith.constant 1.000000e+00 : f32
    %421 = vector.broadcast %cst_110 : f32 to vector<8x8xf32>
    %422 = arith.addf %421, %420 : vector<8x8xf32>
    %423 = arith.divf %421, %422 : vector<8x8xf32>
    %cst_111 = arith.constant dense<0.000000e+00> : vector<8x8xf32>
    %424 = tpu.matmul %390, %391, %cst_111 {dimension_numbers = #tpu.dot_dimension_numbers<[1], [1], [0], [0], [0, 0, 1, 0], [], []>} : vector<8x8xf32>, vector<8x8xf32>, vector<8x8xf32> -> vector<8x8xf32>
    %cst_112 = arith.constant dense<0xFF800000> : vector<8xf32>
    %425 = vector.multi_reduction <maximumf>, %424, %cst_112 [1] : vector<8x8xf32> to vector<8xf32>
    %426 = vector.shape_cast %425 : vector<8xf32> to vector<8x1xf32>
    %427 = vector.broadcast %426 : vector<8x1xf32> to vector<8x8xf32>
    %428 = arith.subf %424, %427 : vector<8x8xf32>
    %429 = math.exp %428 : vector<8x8xf32>
    %430 = arith.mulf %429, %414 : vector<8x8xf32>
    %cst_113 = arith.constant dense<0.000000e+00> : vector<8xf32>
    %431 = vector.multi_reduction <add>, %430, %cst_113 [1] : vector<8x8xf32> to vector<8xf32>
    %432 = vector.shape_cast %431 : vector<8xf32> to vector<8x1xf32>
    %cst_114 = arith.constant 9.99999968E-21 : f32
    %433 = vector.broadcast %cst_114 : f32 to vector<8x1xf32>
    %434 = arith.addf %432, %433 : vector<8x1xf32>
    %435 = arith.mulf %430, %423 : vector<8x8xf32>
    %cst_115 = arith.constant dense<0.000000e+00> : vector<8x8xf32>
    %436 = tpu.matmul %435, %392, %cst_115 {dimension_numbers = #tpu.dot_dimension_numbers<[1], [0], [0], [1], [0, 0, 1, 1], [], []>} : vector<8x8xf32>, vector<8x8xf32>, vector<8x8xf32> -> vector<8x8xf32>
    %437 = tpu.reciprocal %434 {approx = true} : vector<8x1xf32> -> vector<8x1xf32>
    %438 = vector.broadcast %437 : vector<8x1xf32> to vector<8x8xf32>
    %439 = arith.mulf %436, %438 : vector<8x8xf32>
    %440 = tpu.concatenate %82, %133, %184, %235, %286, %337, %388, %439 in 0 : vector<8x8xf32>, vector<8x8xf32>, vector<8x8xf32>, vector<8x8xf32>, vector<8x8xf32>, vector<8x8xf32>, vector<8x8xf32>, vector<8x8xf32> -> vector<64x8xf32>
    %cst_116 = arith.constant dense<0.000000e+00> : vector<64x8xf32>
    %441 = tpu.matmul %440, %8, %cst_116 {dimension_numbers = #tpu.dot_dimension_numbers<[1], [0], [0], [1], [0, 0, 1, 1], [], []>} : vector<64x8xf32>, vector<8x8xf32>, vector<64x8xf32> -> vector<64x8xf32>
    %442 = arith.addf %25, %441 : vector<64x8xf32>
    %443 = vector.broadcast %4 : vector<1x8xf32> to vector<64x8xf32>
    %444 = arith.addf %442, %443 : vector<64x8xf32>
    %cst_117 = arith.constant dense<0.000000e+00> : vector<64x16xf32>
    %445 = tpu.matmul %444, %9, %cst_117 {dimension_numbers = #tpu.dot_dimension_numbers<[1], [0], [0], [1], [0, 0, 1, 1], [], []>} : vector<64x8xf32>, vector<8x16xf32>, vector<64x16xf32> -> vector<64x16xf32>
    %446 = vector.broadcast %5 : vector<1x16xf32> to vector<64x16xf32>
    %447 = arith.addf %445, %446 : vector<64x16xf32>
    %cst_118 = arith.constant 0.000000e+00 : f32
    %448 = vector.broadcast %cst_118 : f32 to vector<64x16xf32>
    %449 = arith.maximumf %447, %448 : vector<64x16xf32>
    %cst_119 = arith.constant dense<0.000000e+00> : vector<64x8xf32>
    %450 = tpu.matmul %449, %10, %cst_119 {dimension_numbers = #tpu.dot_dimension_numbers<[1], [0], [0], [1], [0, 0, 1, 1], [], []>} : vector<64x16xf32>, vector<16x8xf32>, vector<64x8xf32> -> vector<64x8xf32>
    %451 = arith.addf %444, %450 : vector<64x8xf32>
    %452 = vector.broadcast %6 : vector<1x8xf32> to vector<64x8xf32>
    %453 = arith.addf %451, %452 : vector<64x8xf32>
    %454 = vector.extract_strided_slice %453 {offsets = [0, 0], sizes = [8, 8], strides = [1, 1]} : vector<64x8xf32> to vector<8x8xf32>
    %cst_120 = arith.constant dense<0xFF800000> : vector<8xf32>
    %455 = vector.multi_reduction <maximumf>, %454, %cst_120 [0] : vector<8x8xf32> to vector<8xf32>
    %456 = vector.shape_cast %455 : vector<8xf32> to vector<1x8xf32>
    %457 = vector.extract_strided_slice %453 {offsets = [8, 0], sizes = [8, 8], strides = [1, 1]} : vector<64x8xf32> to vector<8x8xf32>
    %cst_121 = arith.constant dense<0xFF800000> : vector<8xf32>
    %458 = vector.multi_reduction <maximumf>, %457, %cst_121 [0] : vector<8x8xf32> to vector<8xf32>
    %459 = vector.shape_cast %458 : vector<8xf32> to vector<1x8xf32>
    %460 = vector.extract_strided_slice %453 {offsets = [16, 0], sizes = [8, 8], strides = [1, 1]} : vector<64x8xf32> to vector<8x8xf32>
    %cst_122 = arith.constant dense<0xFF800000> : vector<8xf32>
    %461 = vector.multi_reduction <maximumf>, %460, %cst_122 [0] : vector<8x8xf32> to vector<8xf32>
    %462 = vector.shape_cast %461 : vector<8xf32> to vector<1x8xf32>
    %463 = vector.extract_strided_slice %453 {offsets = [24, 0], sizes = [8, 8], strides = [1, 1]} : vector<64x8xf32> to vector<8x8xf32>
    %cst_123 = arith.constant dense<0xFF800000> : vector<8xf32>
    %464 = vector.multi_reduction <maximumf>, %463, %cst_123 [0] : vector<8x8xf32> to vector<8xf32>
    %465 = vector.shape_cast %464 : vector<8xf32> to vector<1x8xf32>
    %466 = vector.extract_strided_slice %453 {offsets = [32, 0], sizes = [8, 8], strides = [1, 1]} : vector<64x8xf32> to vector<8x8xf32>
    %cst_124 = arith.constant dense<0xFF800000> : vector<8xf32>
    %467 = vector.multi_reduction <maximumf>, %466, %cst_124 [0] : vector<8x8xf32> to vector<8xf32>
    %468 = vector.shape_cast %467 : vector<8xf32> to vector<1x8xf32>
    %469 = vector.extract_strided_slice %453 {offsets = [40, 0], sizes = [8, 8], strides = [1, 1]} : vector<64x8xf32> to vector<8x8xf32>
    %cst_125 = arith.constant dense<0xFF800000> : vector<8xf32>
    %470 = vector.multi_reduction <maximumf>, %469, %cst_125 [0] : vector<8x8xf32> to vector<8xf32>
    %471 = vector.shape_cast %470 : vector<8xf32> to vector<1x8xf32>
    %472 = vector.extract_strided_slice %453 {offsets = [48, 0], sizes = [8, 8], strides = [1, 1]} : vector<64x8xf32> to vector<8x8xf32>
    %cst_126 = arith.constant dense<0xFF800000> : vector<8xf32>
    %473 = vector.multi_reduction <maximumf>, %472, %cst_126 [0] : vector<8x8xf32> to vector<8xf32>
    %474 = vector.shape_cast %473 : vector<8xf32> to vector<1x8xf32>
    %475 = vector.extract_strided_slice %453 {offsets = [56, 0], sizes = [8, 8], strides = [1, 1]} : vector<64x8xf32> to vector<8x8xf32>
    %cst_127 = arith.constant dense<0xFF800000> : vector<8xf32>
    %476 = vector.multi_reduction <maximumf>, %475, %cst_127 [0] : vector<8x8xf32> to vector<8xf32>
    %477 = vector.shape_cast %476 : vector<8xf32> to vector<1x8xf32>
    %478 = tpu.concatenate %456, %459, %462, %465, %468, %471, %474, %477 in 0 : vector<1x8xf32>, vector<1x8xf32>, vector<1x8xf32>, vector<1x8xf32>, vector<1x8xf32>, vector<1x8xf32>, vector<1x8xf32>, vector<1x8xf32> -> vector<8x8xf32>
    %cst_128 = arith.constant dense<0.000000e+00> : vector<8x16xf32>
    %479 = tpu.matmul %478, %11, %cst_128 {dimension_numbers = #tpu.dot_dimension_numbers<[1], [0], [0], [1], [0, 0, 1, 1], [], []>} : vector<8x8xf32>, vector<8x16xf32>, vector<8x16xf32> -> vector<8x16xf32>
    %480 = vector.broadcast %7 : vector<1x16xf32> to vector<8x16xf32>
    %481 = arith.addf %479, %480 : vector<8x16xf32>
    %cst_129 = arith.constant 0.000000e+00 : f32
    %482 = vector.broadcast %cst_129 : f32 to vector<8x16xf32>
    %483 = arith.maximumf %481, %482 : vector<8x16xf32>
    %cst_130 = arith.constant dense<0.000000e+00> : vector<8x128xf32>
    %484 = tpu.matmul %483, %12, %cst_130 {dimension_numbers = #tpu.dot_dimension_numbers<[1], [0], [0], [1], [0, 0, 1, 1], [], []>} : vector<8x16xf32>, vector<16x128xf32>, vector<8x128xf32> -> vector<8x128xf32>
    %485 = vector.broadcast %13 : vector<1x128xf32> to vector<8x128xf32>
    %486 = arith.addf %484, %485 : vector<8x128xf32>
    %c0_131 = arith.constant 0 : index
    %c0_132 = arith.constant 0 : index
    %487 = vector.load %arg4[%c0_131, %c0_132] : memref<8x128xf32, #tpu.memory_space<vmem>>, vector<8x128xf32>
    tpu.vector_store %arg4[%c0_131, %c0_132], %486 {strides = array<i32>} : memref<8x128xf32, #tpu.memory_space<vmem>>, vector<8x128xf32>,
    return
  }
  func.func @transform_0(%arg0: i32) -> (i32, i32) {
    %c0_i32 = arith.constant 0 : i32
    %c0_i32_0 = arith.constant 0 : i32
    return %arg0, %c0_i32 : i32, i32
  }
  func.func @transform_1(%arg0: i32) -> (i32, i32) {
    %c0_i32 = arith.constant 0 : i32
    %c0_i32_0 = arith.constant 0 : i32
    %c0_i32_1 = arith.constant 0 : i32
    return %c0_i32, %c0_i32_0 : i32, i32
  }
  func.func @transform_2(%arg0: i32) -> i32 {
    %c0_i32 = arith.constant 0 : i32
    %c0_i32_0 = arith.constant 0 : i32
    return %c0_i32 : i32
  }
  func.func @transform_3(%arg0: i32) -> (i32, i32) {
    %c0_i32 = arith.constant 0 : i32
    %c0_i32_0 = arith.constant 0 : i32
    return %arg0, %c0_i32 : i32, i32
  }
}

</mosaic_0001>

<bundles_post_ra>
// kernel: se3_classification_forward.1
= control target key start
LH: loop header
LB: loop body
LE: loop exit
PB: predicated region body
PF: predicated region fallthrough
CT: control target
= control target key end

     0   :  { %8 = vsyncpa [#allocation3], 0  ;;  %s4765_s0 = inlined_call_operand.vmem [shape: f32[64,4], index: 0, kind: input, shape index: {}]   ;;  %s4766_s1 = inlined_call_operand.vmem [shape: f32[72,128], index: 1, kind: input, shape index: {}]   ;;  %s4767_s2 = inlined_call_operand.vmem [shape: f32[4], index: 2, kind: input, shape index: {}]   ;;  %s4768_s3 = inlined_call_operand.vmem [shape: f32[8,128], index: 3, kind: output, shape index: {}]  }
   0x1   :  { %s19_s14 = sshll.u32 %s4767_s2, 4  ;;  %s20_s14 = int_to_ptr.vmem [resolvable:$true] %s19_s14 }
   0x2   :  { %s4079_s15 = scalar_lea.vmem %s20_s14, 16  ;;  %p4084_p1 = scmp.lt.s32.totalorder %s20_s14, %s20_s14 }
   0x3   :  { %p4080_p0 = scmp.ne.s32.totalorder %s20_s14, %s4079_s15  ;;  %p4085_p2 = scmp.lt.s32.totalorder %s4079_s15, %s4079_s15 }
   0x5   :  { %p4086_p3 = por %p4085_p2, %p4084_p1 }
   0x7   :  { %p4087_p4 = pnand %p4086_p3, %p4080_p0 }
   0x9   :  { %4090 = shalt.err (!%p4087_p4)
}
   0xa   :  { %s4093_s16 = smov [#allocation2]  }
   0xb   :  { %22 = dma.vmem_to_smem %s20_s14, 16, %s4093_s16, [#allocation3]  }
   0xc   :  { %4091 = dma.done.wait [#allocation3], 16  }
   0xd   :  { %4092 = vsyncadd [#allocation3], 4294967280 }
   0xe   :  { %26 = sfence }
   0xf   :  { %v47_v0 = vld [vmem:[%s4765_s0] sm:$0xff]  ;;  %v4130_v1 = vld [vmem:[%s4765_s0 + $0x8] sm:$0xff]  ;;  %v4094_v2 = vmov 3   ;;  %vm144_vm0 = vcmask 23552   ;;  %v4095_v4 = vmov 0.0   ;;  %vm4096_vm1 = vmmov 0  }
  0x10   :  { %3981 = vset.pattern.permute.xlu0 %v4094_v2  ;;  %3982 = vset.pattern.permute.xlu1 %v4094_v2  ;;  %v143_v3 = vmul.f32 %v47_v0, %v47_v0  ;;  %v4097_v6 = vmov 1.0   ;;  %v4154_v7 = vld [vmem:[%s4766_s1 + $0x2] ss:$0 sm:$0xff]  ;;  %v4161_v9 = vld [vmem:[%s4766_s1 + $0x3] ss:$0 sm:$0xff]  ;;  %s4098_s24 = smov 112   ;;  %v492_v15 = vmul.f32 %v4130_v1, %v4130_v1  ;;  %v296_v23 = vlaneseq }
  0x11   :  { %57 = vperm.xlu0 %3981, %v47_v0   ;;  %62 = vperm.xlu1 %3982, %v4130_v1   ;;  %s4099_s25 = smov 120   ;;  %vm327_vm2 = vcmask 64512   ;;  %v4198_v21 = vld [vmem:[%s4765_s0 + $0x10] sm:$0xff]  ;;  %s43_s28 = sld [smem:[#allocation2]]  ;;  %vm3162_vm3 = vcmask 130048   ;;  %vm3368_vm4 = vcmask 1040384  }
  0x12   :  { %3750 = vmatprep.subr.mxu1 %v4095_v4  ;;  %3752 = vmatprep.mubr.msk.f32.mxu1 %vm4096_vm1, %v4095_v4  ;;  %v145_v5 = vsel %vm144_vm0, %v143_v3, 0.0  ;;  %v493_v16 = vsel %vm144_vm0, %v492_v15, 0.0  ;;  %v832_v24 = vmul.f32 %v4198_v21, %v4198_v21  ;;  %v297_v26 = vshrl.u32 %v296_v23, 7  ;;  %s3544_s29 = sld [smem:[#allocation2 + $0x2]]  ;;  %s3543_s30 = sld [smem:[#allocation2 + $0x1]] }
  0x13   :  { %3751 = vmatpush3.xpose.msk.msra.mxu1 %vm144_vm0, %v143_v3  ;;  %3760 = vmatprep.subr.mxu0 %v4095_v4  ;;  %s3545_s4 = sld [smem:[#allocation2 + $0x3]]  ;;  %vm3370_vm5 = vcmask 1041408   ;;  %vm3372_vm6 = vcmask 1042432   ;;  %vm3374_vm7 = vcmask 1043456   ;;  %vm3376_vm8 = vcmask 1044480  }
  0x14   :  { %3755 = vmatprep.subr.mxu1 %v4095_v4  ;;  %3762 = vmatprep.mubr.msk.f32.mxu0 %vm4096_vm1, %v4095_v4  ;;  %v833_v28 = vsel %vm144_vm0, %v832_v24, 0.0  ;;  %v4205_v30 = vsub.s32 0, %v297_v26  ;;  %vm3378_vm9 = vcmask 1045504   ;;  %vm3380_vm10 = vcmask 1046528  }
  0x16   :  { %3753 = vmatmul.mubr.msk.f32.vlgmr.msra.gmra.mrb[0].mxu1 %vm144_vm0, %v4097_v6 }
  0x17   :  { %3756 = vmatpush3.xpose.msk.msra.mxu1 %vm144_vm0, %v47_v0  ;;  %3757 = vmatprep.mubr.msk.f32.mxu1 %vm4096_vm1, %v4095_v4  ;;  %v4218_v43 = vstv %s43_s28 }
  0x18   :  { %3765 = vmatprep.subr.mxu1 %v4095_v4  ;;  %v4221_v45 = vstv %s3544_s29  ;;  %v4223_v46 = vstv %s3543_s30 }
  0x19   :  { %v4227_v49 = vstv %s3545_s4 }
  0x1a   :  { %3758 = vmatmul.mubr.msk.f32.vlgmr.msra.gmra.mrb[2].mxu1 %vm144_vm0, %v47_v0 }
  0x1b   :  { %3767 = vmatprep.mubr.msk.f32.mxu1 %vm4096_vm1, %v4095_v4 }
  0x35   :  { %146 = vadd.xlane.f32.xlu1 %v145_v5 }
  0x90   :  { %v4156_v8 = vpop.permute.xlu0 %57  ;;  %v4163_v10 = vpop.permute.xlu1 %62 }
  0x91   :  { %v123_v11 = vmul.f32 %v4154_v7, %v4156_v8  ;;  %v124_v12 = vmul.f32 %v4154_v7, %v4163_v10 }
  0x93   :  { %v135_v13 = vadd.f32 %v4161_v9, %v123_v11  ;;  %v136_v14 = vadd.f32 %v4161_v9, %v124_v12 }
  0x95   :  { %414 = vrot.lane.b32.xlu1 %v135_v13, %s4098_s24  ;;  %325 = vrot.lane.b32.xlu0 %v135_v13, %s4099_s25 }
  0x99   :  { %666 = vrot.lane.b32.xlu0 %v136_v14, %s4099_s25 }
  0xb9   :  { %494 = vadd.xlane.f32.xlu1 %v493_v16 }
  0xc2   :  { %v147_v17 = vpop.xlane.xlu1 %146 }
  0xca   :  { %754 = vrot.lane.b32.xlu1 %v136_v14, %s4098_s24 }
  0xe9   :  { %v220_v22 = vpop.f32.mrb[0].mxu1 }
  0xea   :  { %v3754_v25 = vpop.f32.mrb[1].mxu1  ;;  %v299_v31 = vrot.slane %v220_v22, %v4205_v30 }
  0xec   :  { %v300_v33 = vadd.f32 %v299_v31, %v147_v17 }
  0xed   :  { %v292_v27 = vpop.f32.mrb[2].mxu1 }
  0xee   :  { %v3759_v29 = vpop.f32.mrb[3].mxu1  ;;  %834 = vadd.xlane.f32.xlu1 %v833_v28  ;;  %v301_v32 = vmul.f32 2.0, %v292_v27 }
  0xf0   :  { %v302_v34 = vsub.f32 %v300_v33, %v301_v32 }
  0xf2   :  { %v303_v42 = vmax.f32 %v302_v34, 0.0 }
  0xf4   :  { %v305_v44 = vmul.f32 %v4218_v43, %v303_v42  ;;  %v315_v47 = vmul.f32 %v4221_v45, %v303_v42 }
  0xf6   :  { %v307_v48 = vadd.f32 %v4223_v46, %v305_v44  ;;  %v317_v50 = vadd.f32 %v4227_v49, %v315_v47 }
  0xf8   :  { %v3554_v51 = vmul.f32 -1.442695, %v307_v48  ;;  %v3555_v52 = vmul.f32 -1.442695, %v317_v50 }
  0xfa   :  { %3983 = vpow2.f32 %v3554_v51 }
  0xfb   :  { %3985 = vpow2.f32 %v3555_v52 }
 0x104   :  { %v3984_v53 = vpop.eup %3983 }
 0x105   :  { %v3986_v54 = vpop.eup %3985  ;;  %v311_v55 = vadd.f32 1.0, %v3984_v53 }
 0x106   :  { %v321_v58 = vadd.f32 1.0, %v3986_v54 }
 0x107   :  { %v415_v18 = vpop.permute.xlu1 %414  ;;  %v326_v19 = vpop.permute.xlu0 %325  ;;  %3987 = vrcp.f32 %v311_v55 }
 0x108   :  { %3761 = vmatpush3.xpose.msk.msra.mxu0 %vm327_vm2, %v326_v19  ;;  %3766 = vmatpush3.msra.mxu1 %v415_v18 }
 0x109   :  { %3770 = vmatprep.subr.mxu0 %v4095_v4  ;;  %3775 = vmatprep.subr.mxu1 %v4095_v4 }
 0x10b   :  { %3763 = vmatmul.mubr.msk.f32.vlgmr.msra.gmra.mrb[0].mxu0 %vm327_vm2, %v135_v13  ;;  %v667_v20 = vpop.permute.xlu0 %666  ;;  %v4254_v13 = vld [vmem:[%s4765_s0 + $0x18] sm:$0xff] }
 0x10c   :  { %3771 = vmatpush3.xpose.msk.msra.mxu0 %vm144_vm0, %v492_v15  ;;  %3772 = vmatprep.mubr.msk.f32.mxu0 %vm4096_vm1, %v4095_v4 }
 0x10d   :  { %3780 = vmatprep.subr.mxu0 %v4095_v4 }
 0x10f   :  { %3773 = vmatmul.mubr.msk.f32.vlgmr.msra.gmra.mrb[2].mxu0 %vm144_vm0, %v4097_v6 }
 0x110   :  { %3781 = vmatpush3.xpose.msk.msra.mxu0 %vm327_vm2, %v667_v20  ;;  %3782 = vmatprep.mubr.msk.f32.mxu0 %vm4096_vm1, %v4095_v4 }
 0x111   :  { %3790 = vmatprep.subr.mxu0 %v4095_v4  ;;  %v3988_v63 = vpop.eup %3987 }
 0x113   :  { %3783 = vmatmul.mubr.msk.f32.vlgmr.msra.gmra.mrb[4].mxu0 %vm327_vm2, %v136_v14  ;;  %v1172_v14 = vmul.f32 %v4254_v13, %v4254_v13 }
 0x114   :  { %3792 = vmatprep.mubr.msk.f32.mxu0 %vm4096_vm1, %v4095_v4  ;;  %3791 = vmatpush3.xpose.msk.msra.mxu0 %vm144_vm0, %v832_v24 }
 0x115   :  { %3800 = vmatprep.subr.mxu0 %v4095_v4 }
 0x117   :  { %3793 = vmatmul.mubr.msk.f32.vlgmr.msra.gmra.mrb[6].mxu0 %vm144_vm0, %v4097_v6 }
 0x118   :  { %3802 = vmatprep.mubr.msk.f32.mxu0 %vm4096_vm1, %v4095_v4 }
 0x146   :  { %v495_v5 = vpop.xlane.xlu1 %494 }
 0x14a   :  { %v755_v12 = vpop.permute.xlu1 %754 }
 0x17b   :  { %v835_v23 = vpop.xlane.xlu1 %834 }
 0x1de   :  { %v398_v35 = vpop.f32.mrb[0].mxu0 }
 0x1df   :  { %v3764_v36 = vpop.f32.mrb[1].mxu0  ;;  %v402_v37 = vsel %vm327_vm2, %v398_v35, -inf }
 0x1e0   :  { %403 = vmax.xlane.f32.xlu0 %v402_v37  ;;  %v4291_v36 = vld [vmem:[%s4765_s0 + $0x20] sm:$0xff] }
 0x1e2   :  { %v4213_v38 = vpop.f32.mrb[2].mxu0 }
 0x1e3   :  { %v3774_v39 = vpop.f32.mrb[3].mxu0  ;;  %v644_v29 = vrot.slane %v4213_v38, %v4205_v30 }
 0x1e4   :  { %v1512_v39 = vmul.f32 %v4291_v36, %v4291_v36 }
 0x1e5   :  { %v645_v33 = vadd.f32 %v644_v29, %v495_v5  ;;  %v4344_v29 = vld [vmem:[%s4765_s0 + $0x30] sm:$0xff] }
 0x1e6   :  { %v4215_v40 = vpop.f32.mrb[4].mxu0 }
 0x1e7   :  { %v3784_v41 = vpop.f32.mrb[5].mxu0  ;;  %v742_v15 = vsel %vm327_vm2, %v4215_v40, -inf }
 0x1e8   :  { %v1513_v41 = vsel %vm144_vm0, %v1512_v39, 0.0 }
 0x1ea   :  { %v905_v19 = vpop.f32.mrb[6].mxu0 }
 0x1eb   :  { %v984_v20 = vrot.slane %v905_v19, %v4205_v30  ;;  %v3794_v22 = vpop.f32.mrb[7].mxu0 }
 0x1ed   :  { %v4275_v24 = vadd.f32 %v984_v20, %v835_v23 }
 0x1f6   :  { %67 = vperm.xlu0 %3981, %v4198_v21  }
 0x26d   :  { %v404_v56 = vpop.xlane.xlu0 %403 }
 0x26e   :  { %v405_v57 = vsub.f32 %v398_v35, %v404_v56 }
 0x270   :  { %v406_v59 = vmul.f32 1.442695, %v405_v57 }
 0x272   :  { %3989 = vpow2.f32 %v406_v59 }
 0x273   :  { %3991 = vrcp.f32 %v321_v58 }
 0x275   :  { %v4230_v60 = vpop.permute.xlu0 %67 }
 0x276   :  { %v125_v61 = vmul.f32 %v4154_v7, %v4230_v60 }
 0x278   :  { %v137_v62 = vadd.f32 %v4161_v9, %v125_v61 }
 0x27a   :  { %1094 = vrot.lane.b32.xlu1 %v137_v62, %s4098_s24  ;;  %1006 = vrot.lane.b32.xlu0 %v137_v62, %s4099_s25 }
 0x27c   :  { %v3990_v0 = vpop.eup %3989 }
 0x27d   :  { %v4237_v2 = vmul.f32 %v3990_v0, %v3988_v63  ;;  %v3992_v3 = vpop.eup %3991 }
 0x27f   :  { %v413_v11 = vmul.f32 %v3992_v3, %v4237_v2 }
 0x281   :  { %3768 = vmatmul.mubr.msk.f32.vlgmr.msra.gmra.mrb[4].mxu1 %vm327_vm2, %v413_v11 }
 0x282   :  { %3776 = vmatpush3.xpose.msk.msra.mxu1 %vm144_vm0, %v4130_v1  ;;  %3777 = vmatprep.mubr.msk.f32.mxu1 %vm4096_vm1, %v4095_v4 }
 0x283   :  { %3785 = vmatprep.subr.mxu1 %v4095_v4 }
 0x285   :  { %3778 = vmatmul.mubr.msk.f32.vlgmr.msra.gmra.mrb[6].mxu1 %vm144_vm0, %v4130_v1  ;;  %v1173_v1 = vsel %vm144_vm0, %v1172_v14, 0.0 }
 0x286   :  { %3786 = vmatpush3.msra.mxu1 %v755_v12  ;;  %3787 = vmatprep.mubr.msk.f32.mxu1 %vm4096_vm1, %v4095_v4 }
 0x287   :  { %3795 = vmatprep.subr.mxu1 %v4095_v4 }
 0x299   :  { %743 = vmax.xlane.f32.xlu0 %v742_v15 }
 0x29e   :  { %1174 = vadd.xlane.f32.xlu1 %v1173_v1 }
 0x2af   :  { %72 = vperm.xlu0 %3981, %v4254_v13  }
 0x2ec   :  { %v1007_v16 = vpop.permute.xlu0 %1006 }
 0x2ed   :  { %3801 = vmatpush3.xpose.msk.msra.mxu0 %vm327_vm2, %v1007_v16 }
 0x2ee   :  { %3810 = vmatprep.subr.mxu0 %v4095_v4 }
 0x2f0   :  { %3803 = vmatmul.mubr.msk.f32.vlgmr.msra.gmra.mrb[8].mxu0 %vm327_vm2, %v137_v62  ;;  %v1095_v62 = vpop.permute.xlu1 %1094 }
 0x2f1   :  { %3811 = vmatpush3.xpose.msk.msra.mxu0 %vm144_vm0, %v1172_v14  ;;  %3812 = vmatprep.mubr.msk.f32.mxu0 %vm4096_vm1, %v4095_v4 }
 0x2f2   :  { %3820 = vmatprep.subr.mxu0 %v4095_v4 }
 0x2f4   :  { %3813 = vmatmul.mubr.msk.f32.vlgmr.msra.gmra.mrb[10].mxu0 %vm144_vm0, %v4097_v6 }
 0x2f5   :  { %3822 = vmatprep.mubr.msk.f32.mxu0 %vm4096_vm1, %v4095_v4 }
 0x326   :  { %v744_v17 = vpop.xlane.xlu0 %743 }
 0x327   :  { %v745_v18 = vsub.f32 %v4215_v40, %v744_v17 }
 0x329   :  { %v746_v51 = vmul.f32 1.442695, %v745_v18 }
 0x32e   :  { %v4277_v25 = vpop.permute.xlu0 %72 }
 0x32f   :  { %v126_v26 = vmul.f32 %v4154_v7, %v4277_v25 }
 0x331   :  { %v138_v27 = vadd.f32 %v4161_v9, %v126_v26 }
 0x333   :  { %1434 = vrot.lane.b32.xlu1 %v138_v27, %s4098_s24  ;;  %1346 = vrot.lane.b32.xlu0 %v138_v27, %s4099_s25 }
 0x354   :  { %v4284_v28 = vpop.f32.mrb[4].mxu1 }
 0x355   :  { %v3769_v31 = vpop.f32.mrb[5].mxu1 }
 0x357   :  { %1514 = vadd.xlane.f32.xlu1 %v1513_v41 }
 0x358   :  { %v637_v32 = vpop.f32.mrb[6].mxu1 }
 0x359   :  { %v646_v34 = vmul.f32 2.0, %v637_v32  ;;  %v3779_v35 = vpop.f32.mrb[7].mxu1 }
 0x35b   :  { %v647_v37 = vsub.f32 %v645_v33, %v646_v34 }
 0x35d   :  { %v648_v40 = vmax.f32 %v647_v37, 0.0 }
 0x35f   :  { %v649_v38 = vmul.f32 %v648_v40, %v4218_v43  ;;  %v657_v42 = vmul.f32 %v648_v40, %v4221_v45 }
 0x361   :  { %v650_v44 = vadd.f32 %v649_v38, %v4223_v46  ;;  %v658_v47 = vadd.f32 %v657_v42, %v4227_v49 }
 0x363   :  { %v3563_v48 = vmul.f32 -1.442695, %v650_v44  ;;  %v3564_v50 = vmul.f32 -1.442695, %v658_v47 }
 0x365   :  { %3993 = vpow2.f32 %v3563_v48 }
 0x366   :  { %3995 = vpow2.f32 %v3564_v50 }
 0x367   :  { %3997 = vpow2.f32 %v746_v51 }
 0x36f   :  { %v3994_v52 = vpop.eup %3993 }
 0x370   :  { %v3996_v53 = vpop.eup %3995  ;;  %v654_v54 = vadd.f32 1.0, %v3994_v52  ;;  %v1175_v52 = vpop.xlane.xlu1 %1174 }
 0x371   :  { %v662_v55 = vadd.f32 1.0, %v3996_v53  ;;  %v3998_v56 = vpop.eup %3997 }
 0x372   :  { %3999 = vrcp.f32 %v654_v54 }
 0x373   :  { %4001 = vrcp.f32 %v662_v55  ;;  %v4370_v55 = vld [vmem:[%s4765_s0 + $0x28] sm:$0xff] }
 0x37c   :  { %v4000_v57 = vpop.eup %3999 }
 0x37d   :  { %v4300_v58 = vmul.f32 %v4000_v57, %v3998_v56  ;;  %v4002_v59 = vpop.eup %4001  ;;  %v4375_v57 = vmul.f32 %v4370_v55, %v4370_v55 }
 0x37f   :  { %v753_v61 = vmul.f32 %v4002_v59, %v4300_v58 }
 0x381   :  { %3788 = vmatmul.mubr.msk.f32.vlgmr.msra.gmra.mrb[8].mxu1 %vm327_vm2, %v753_v61 }
 0x382   :  { %3796 = vmatpush3.xpose.msk.msra.mxu1 %vm144_vm0, %v4198_v21  ;;  %3797 = vmatprep.mubr.msk.f32.mxu1 %vm4096_vm1, %v4095_v4 }
 0x383   :  { %3805 = vmatprep.subr.mxu1 %v4095_v4 }
 0x385   :  { %3798 = vmatmul.mubr.msk.f32.vlgmr.msra.gmra.mrb[10].mxu1 %vm144_vm0, %v4198_v21 }
 0x386   :  { %3806 = vmatpush3.msra.mxu1 %v1095_v62  ;;  %3807 = vmatprep.mubr.msk.f32.mxu1 %vm4096_vm1, %v4095_v4 }
 0x387   :  { %3815 = vmatprep.subr.mxu1 %v4095_v4 }
 0x3a5   :  { %v1347_v63 = vpop.permute.xlu0 %1346  ;;  %v1435_v54 = vpop.permute.xlu1 %1434 }
 0x3a6   :  { %3821 = vmatpush3.xpose.msk.msra.mxu0 %vm327_vm2, %v1347_v63 }
 0x3a7   :  { %3830 = vmatprep.subr.mxu0 %v4095_v4 }
 0x3a9   :  { %3823 = vmatmul.mubr.msk.f32.vlgmr.msra.gmra.mrb[12].mxu0 %vm327_vm2, %v138_v27 }
 0x3aa   :  { %3831 = vmatpush3.xpose.msk.msra.mxu0 %vm144_vm0, %v1512_v39  ;;  %3832 = vmatprep.mubr.msk.f32.mxu0 %vm4096_vm1, %v4095_v4 }
 0x3ab   :  { %3840 = vmatprep.subr.mxu0 %v4095_v4 }
 0x3ad   :  { %3833 = vmatmul.mubr.msk.f32.vlgmr.msra.gmra.mrb[14].mxu0 %vm144_vm0, %v4097_v6 }
 0x3ae   :  { %3842 = vmatprep.mubr.msk.f32.mxu0 %vm4096_vm1, %v4095_v4 }
 0x3c3   :  { %v1078_v21 = vpop.f32.mrb[8].mxu0 }
 0x3c4   :  { %v3804_v0 = vpop.f32.mrb[9].mxu0  ;;  %v1082_v3 = vsel %vm327_vm2, %v1078_v21, -inf }
 0x3c5   :  { %1083 = vmax.xlane.f32.xlu0 %v1082_v3 }
 0x3c7   :  { %v4327_v5 = vpop.f32.mrb[10].mxu0 }
 0x3c8   :  { %v3814_v11 = vpop.f32.mrb[11].mxu0 }
 0x3db   :  { %77 = vperm.xlu0 %3981, %v4291_v36  }
 0x452   :  { %v1084_v15 = vpop.xlane.xlu0 %1083 }
 0x453   :  { %v1085_v34 = vsub.f32 %v1078_v21, %v1084_v15 }
 0x454   :  { %v4329_v12 = vpop.f32.mrb[8].mxu1 }
 0x455   :  { %v3789_v14 = vpop.f32.mrb[9].mxu1  ;;  %v1086_v35 = vmul.f32 1.442695, %v1085_v34 }
 0x458   :  { %v977_v1 = vpop.f32.mrb[10].mxu1 }
 0x459   :  { %v986_v16 = vmul.f32 2.0, %v977_v1  ;;  %v3799_v17 = vpop.f32.mrb[11].mxu1 }
 0x45a   :  { %v4331_v18 = vpop.permute.xlu0 %77 }
 0x45b   :  { %v987_v19 = vsub.f32 %v4275_v24, %v986_v16  ;;  %v127_v20 = vmul.f32 %v4154_v7, %v4331_v18  ;;  %v2192_v16 = vmul.f32 %v4344_v29, %v4344_v29 }
 0x45d   :  { %v988_v22 = vmax.f32 %v987_v19, 0.0  ;;  %v139_v23 = vadd.f32 %v4161_v9, %v127_v20  ;;  %v2193_v17 = vsel %vm144_vm0, %v2192_v16, 0.0  ;;  %v1324_v20 = vrot.slane %v4327_v5, %v4205_v30  ;;  %v4428_v5 = vld [vmem:[%s4765_s0 + $0x38] sm:$0xff] }
 0x45f   :  { %v989_v26 = vmul.f32 %v988_v22, %v4218_v43  ;;  %v997_v27 = vmul.f32 %v988_v22, %v4221_v45  ;;  %1774 = vrot.lane.b32.xlu1 %v139_v23, %s4098_s24  ;;  %1686 = vrot.lane.b32.xlu0 %v139_v23, %s4099_s25 }
 0x461   :  { %v990_v24 = vadd.f32 %v989_v26, %v4223_v46  ;;  %v998_v31 = vadd.f32 %v997_v27, %v4227_v49  ;;  %v1325_v26 = vadd.f32 %v1324_v20, %v1175_v52  ;;  %v749_v52 = vsel %vm327_vm2, %v4300_v58, 0.0 }
 0x463   :  { %v3572_v32 = vmul.f32 -1.442695, %v990_v24  ;;  %v3573_v33 = vmul.f32 -1.442695, %v998_v31  ;;  %87 = vperm.xlu1 %3982, %v4344_v29  }
 0x465   :  { %4003 = vpow2.f32 %v3572_v32 }
 0x466   :  { %4005 = vpow2.f32 %v3573_v33 }
 0x467   :  { %4007 = vpow2.f32 %v1086_v35 }
 0x46f   :  { %v4004_v37 = vpop.eup %4003 }
 0x470   :  { %v4006_v39 = vpop.eup %4005  ;;  %v994_v40 = vadd.f32 1.0, %v4004_v37 }
 0x471   :  { %v1002_v41 = vadd.f32 1.0, %v4006_v39  ;;  %v4008_v38 = vpop.eup %4007 }
 0x472   :  { %4009 = vrcp.f32 %v994_v40 }
 0x473   :  { %4011 = vrcp.f32 %v1002_v41  ;;  %v2532_v41 = vmul.f32 %v4428_v5, %v4428_v5 }
 0x47c   :  { %v4010_v42 = vpop.eup %4009  ;;  %v4349_v44 = vpop.f32.mrb[12].mxu0 }
 0x47d   :  { %v3824_v47 = vpop.f32.mrb[13].mxu0  ;;  %v1422_v48 = vsel %vm327_vm2, %v4349_v44, -inf  ;;  %v4353_v50 = vmul.f32 %v4010_v42, %v4008_v38  ;;  %v4012_v51 = vpop.eup %4011  ;;  %v2533_v42 = vsel %vm144_vm0, %v2532_v41, 0.0 }
 0x47e   :  { %1423 = vmax.xlane.f32.xlu0 %v1422_v48 }
 0x47f   :  { %v1093_v53 = vmul.f32 %v4012_v51, %v4353_v50 }
 0x480   :  { %v4408_v15 = vpop.f32.mrb[14].mxu0 }
 0x481   :  { %3808 = vmatmul.mubr.msk.f32.vlgmr.msra.gmra.mrb[12].mxu1 %vm327_vm2, %v1093_v53  ;;  %v3834_v1 = vpop.f32.mrb[15].mxu0  ;;  %v1089_v53 = vsel %vm327_vm2, %v4353_v50, 0.0 }
 0x482   :  { %3816 = vmatpush3.xpose.msk.msra.mxu1 %vm144_vm0, %v4254_v13  ;;  %3817 = vmatprep.mubr.msk.f32.mxu1 %vm4096_vm1, %v4095_v4 }
 0x483   :  { %3825 = vmatprep.subr.mxu1 %v4095_v4 }
 0x485   :  { %3818 = vmatmul.mubr.msk.f32.vlgmr.msra.gmra.mrb[14].mxu1 %vm144_vm0, %v4254_v13  ;;  %v4385_v13 = vpop.xlane.xlu1 %1514 }
 0x486   :  { %3826 = vmatpush3.msra.mxu1 %v1435_v54  ;;  %3827 = vmatprep.mubr.msk.f32.mxu1 %vm4096_vm1, %v4095_v4 }
 0x487   :  { %3835 = vmatprep.subr.mxu1 %v4095_v4 }
 0x494   :  { %82 = vperm.xlu0 %3981, %v4370_v55  }
 0x4d1   :  { %v1687_v56 = vpop.permute.xlu0 %1686  ;;  %v4391_v59 = vpop.permute.xlu1 %1774 }
 0x4d2   :  { %3841 = vmatpush3.xpose.msk.msra.mxu0 %vm327_vm2, %v1687_v56 }
 0x4d3   :  { %3850 = vmatprep.subr.mxu0 %v4095_v4 }
 0x4d5   :  { %3843 = vmatmul.mubr.msk.f32.vlgmr.msra.gmra.mrb[16].mxu0 %vm327_vm2, %v139_v23 }
 0x4d6   :  { %3851 = vmatpush3.xpose.msk.msra.mxu0 %vm144_vm0, %v4375_v57  ;;  %3852 = vmatprep.mubr.msk.f32.mxu0 %vm4096_vm1, %v4095_v4 }
 0x4d7   :  { %3860 = vmatprep.subr.mxu0 %v4095_v4 }
 0x4d9   :  { %3853 = vmatmul.mubr.msk.f32.vlgmr.msra.gmra.mrb[18].mxu0 %vm144_vm0, %v4097_v6 }
 0x4da   :  { %3862 = vmatprep.mubr.msk.f32.mxu0 %vm4096_vm1, %v4095_v4 }
 0x4e2   :  { %v4393_v61 = vpop.permute.xlu1 %87 }
 0x4e3   :  { %v129_v62 = vmul.f32 %v4154_v7, %v4393_v61 }
 0x4e5   :  { %v4398_v63 = vadd.f32 %v4161_v9, %v129_v62 }
 0x4e7   :  { %2366 = vrot.lane.b32.xlu1 %v4398_v63, %s4099_s25 }
 0x50b   :  { %v1424_v21 = vpop.xlane.xlu0 %1423 }
 0x50c   :  { %v1425_v0 = vsub.f32 %v4349_v44, %v1424_v21 }
 0x50e   :  { %v1426_v38 = vmul.f32 1.442695, %v1425_v0 }
 0x513   :  { %v4403_v3 = vpop.permute.xlu0 %82 }
 0x514   :  { %v128_v11 = vmul.f32 %v4154_v7, %v4403_v3 }
 0x516   :  { %v140_v14 = vadd.f32 %v4161_v9, %v128_v11 }
 0x518   :  { %2114 = vrot.lane.b32.xlu1 %v140_v14, %s4098_s24  ;;  %2026 = vrot.lane.b32.xlu0 %v140_v14, %s4099_s25 }
 0x53c   :  { %2194 = vadd.xlane.f32.xlu1 %v2193_v17 }
 0x54d   :  { %2454 = vrot.lane.b32.xlu1 %v4398_v63, %s4098_s24 }
 0x554   :  { %v4417_v19 = vpop.f32.mrb[12].mxu1 }
 0x555   :  { %v3809_v22 = vpop.f32.mrb[13].mxu1 }
 0x558   :  { %v1317_v23 = vpop.f32.mrb[14].mxu1 }
 0x559   :  { %v1326_v27 = vmul.f32 2.0, %v1317_v23  ;;  %v3819_v24 = vpop.f32.mrb[15].mxu1 }
 0x55b   :  { %v1327_v31 = vsub.f32 %v1325_v26, %v1326_v27 }
 0x55d   :  { %v1328_v32 = vmax.f32 %v1327_v31, 0.0 }
 0x55f   :  { %v1329_v33 = vmul.f32 %v1328_v32, %v4218_v43  ;;  %v1337_v34 = vmul.f32 %v1328_v32, %v4221_v45 }
 0x561   :  { %v1330_v35 = vadd.f32 %v1329_v33, %v4223_v46  ;;  %v1338_v37 = vadd.f32 %v1337_v34, %v4227_v49 }
 0x563   :  { %v3581_v39 = vmul.f32 -1.442695, %v1330_v35  ;;  %v3582_v40 = vmul.f32 -1.442695, %v1338_v37 }
 0x565   :  { %4013 = vpow2.f32 %v3581_v39 }
 0x566   :  { %4015 = vpow2.f32 %v3582_v40 }
 0x567   :  { %4017 = vpow2.f32 %v1426_v38 }
 0x56f   :  { %v4014_v44 = vpop.eup %4013 }
 0x570   :  { %v4016_v47 = vpop.eup %4015  ;;  %v1334_v48 = vadd.f32 1.0, %v4014_v44 }
 0x571   :  { %v1342_v51 = vadd.f32 1.0, %v4016_v47  ;;  %2534 = vadd.xlane.f32.xlu1 %v2533_v42  ;;  %v4018_v54 = vpop.eup %4017 }
 0x572   :  { %4019 = vrcp.f32 %v1334_v48 }
 0x573   :  { %4021 = vrcp.f32 %v1342_v51 }
 0x575   :  { %750 = vadd.xlane.f32.xlu1 %v749_v52 }
 0x579   :  { %1090 = vadd.xlane.f32.xlu1 %v1089_v53 }
 0x57c   :  { %v4020_v56 = vpop.eup %4019 }
 0x57d   :  { %v1428_v62 = vmul.f32 %v4020_v56, %v4018_v54  ;;  %v4022_v21 = vpop.eup %4021 }
 0x57f   :  { %v1429_v0 = vsel %vm327_vm2, %v1428_v62, 0.0  ;;  %v1433_v11 = vmul.f32 %v4022_v21, %v1428_v62 }
 0x580   :  { %1430 = vadd.xlane.f32.xlu1 %v1429_v0 }
 0x581   :  { %3828 = vmatmul.mubr.msk.f32.vlgmr.msra.gmra.mrb[16].mxu1 %vm327_vm2, %v1433_v11 }
 0x582   :  { %3836 = vmatpush3.xpose.msk.msra.mxu1 %vm144_vm0, %v4291_v36  ;;  %3837 = vmatprep.mubr.msk.f32.mxu1 %vm4096_vm1, %v4095_v4 }
 0x583   :  { %3845 = vmatprep.subr.mxu1 %v4095_v4 }
 0x585   :  { %3838 = vmatmul.mubr.msk.f32.vlgmr.msra.gmra.mrb[18].mxu1 %vm144_vm0, %v4291_v36  ;;  %v2367_v36 = vpop.permute.xlu1 %2366 }
 0x586   :  { %3846 = vmatpush3.msra.mxu1 %v4391_v59  ;;  %3847 = vmatprep.mubr.msk.f32.mxu1 %vm4096_vm1, %v4095_v4 }
 0x587   :  { %3855 = vmatprep.subr.mxu1 %v4095_v4 }
 0x58a   :  { %v2027_v58 = vpop.permute.xlu0 %2026 }
 0x58b   :  { %3861 = vmatpush3.xpose.msk.msra.mxu0 %vm327_vm2, %v2027_v58 }
 0x58c   :  { %3870 = vmatprep.subr.mxu0 %v4095_v4 }
 0x58e   :  { %3863 = vmatmul.mubr.msk.f32.vlgmr.msra.gmra.mrb[20].mxu0 %vm327_vm2, %v140_v14 }
 0x58f   :  { %3871 = vmatpush3.xpose.msk.msra.mxu0 %vm144_vm0, %v2192_v16  ;;  %3872 = vmatprep.mubr.msk.f32.mxu0 %vm4096_vm1, %v4095_v4 }
 0x590   :  { %3880 = vmatprep.subr.mxu0 %v4095_v4 }
 0x592   :  { %3873 = vmatmul.mubr.msk.f32.vlgmr.msra.gmra.mrb[22].mxu0 %vm144_vm0, %v4097_v6 }
 0x593   :  { %3881 = vmatpush3.xpose.msk.msra.mxu0 %vm327_vm2, %v2367_v36  ;;  %3882 = vmatprep.mubr.msk.f32.mxu0 %vm4096_vm1, %v4095_v4  ;;  %v2115_v36 = vpop.permute.xlu1 %2114 }
 0x594   :  { %3890 = vmatprep.subr.mxu0 %v4095_v4 }
 0x596   :  { %3883 = vmatmul.mubr.msk.f32.vlgmr.msra.gmra.mrb[24].mxu0 %vm327_vm2, %v4398_v63  ;;  %v1853_v63 = vsel %vm144_vm0, %v4375_v57, 0.0 }
 0x597   :  { %3891 = vmatpush3.xpose.msk.msra.mxu0 %vm144_vm0, %v2532_v41  ;;  %3892 = vmatprep.mubr.msk.f32.mxu0 %vm4096_vm1, %v4095_v4 }
 0x598   :  { %3900 = vmatprep.subr.mxu0 %v4095_v4 }
 0x59a   :  { %3893 = vmatmul.mubr.msk.f32.vlgmr.msra.gmra.mrb[26].mxu0 %vm144_vm0, %v4097_v6  ;;  %v1664_v6 = vrot.slane %v4408_v15, %v4205_v30 }
 0x59b   :  { %3902 = vmatprep.mubr.msk.f32.mxu0 %vm4096_vm1, %v4095_v4 }
 0x59c   :  { %v1665_v23 = vadd.f32 %v1664_v6, %v4385_v13 }
 0x5a8   :  { %v1758_v50 = vpop.f32.mrb[16].mxu0 }
 0x5a9   :  { %v3844_v59 = vpop.f32.mrb[17].mxu0  ;;  %v1762_v14 = vsel %vm327_vm2, %v1758_v50, -inf }
 0x5aa   :  { %1763 = vmax.xlane.f32.xlu0 %v1762_v14 }
 0x5ac   :  { %v4476_v1 = vpop.f32.mrb[18].mxu0 }
 0x5ad   :  { %v3854_v16 = vpop.f32.mrb[19].mxu0 }
 0x5ae   :  { %1854 = vadd.xlane.f32.xlu0 %v1853_v63 }
 0x637   :  { %v1764_v41 = vpop.xlane.xlu0 %1763 }
 0x638   :  { %v1765_v42 = vsub.f32 %v1758_v50, %v1764_v41 }
 0x63a   :  { %v1766_v48 = vmul.f32 1.442695, %v1765_v42 }
 0x63b   :  { %v1855_v50 = vpop.xlane.xlu0 %1854 }
 0x654   :  { %v4478_v17 = vpop.f32.mrb[16].mxu1 }
 0x655   :  { %v3829_v20 = vpop.f32.mrb[17].mxu1 }
 0x658   :  { %v1657_v22 = vpop.f32.mrb[18].mxu1 }
 0x659   :  { %v1666_v26 = vmul.f32 2.0, %v1657_v22  ;;  %v3839_v27 = vpop.f32.mrb[19].mxu1  ;;  %v2004_v22 = vrot.slane %v4476_v1, %v4205_v30 }
 0x65b   :  { %v1667_v24 = vsub.f32 %v1665_v23, %v1666_v26  ;;  %v2005_v27 = vadd.f32 %v2004_v22, %v1855_v50 }
 0x65d   :  { %v1668_v31 = vmax.f32 %v1667_v24, 0.0 }
 0x65f   :  { %v1669_v32 = vmul.f32 %v1668_v31, %v4218_v43  ;;  %v1677_v57 = vmul.f32 %v1668_v31, %v4221_v45 }
 0x661   :  { %v1670_v33 = vadd.f32 %v1669_v32, %v4223_v46  ;;  %v1678_v34 = vadd.f32 %v1677_v57, %v4227_v49  ;;  %v4487_v35 = vpop.f32.mrb[20].mxu0 }
 0x662   :  { %v3864_v37 = vpop.f32.mrb[21].mxu0  ;;  %v2102_v15 = vsel %vm327_vm2, %v4487_v35, -inf }
 0x663   :  { %v3590_v39 = vmul.f32 -1.442695, %v1670_v33  ;;  %v3591_v13 = vmul.f32 -1.442695, %v1678_v34  ;;  %2103 = vmax.xlane.f32.xlu0 %v2102_v15 }
 0x665   :  { %4023 = vpow2.f32 %v3590_v39  ;;  %v4491_v40 = vpop.f32.mrb[22].mxu0 }
 0x666   :  { %4025 = vpow2.f32 %v3591_v13  ;;  %v3874_v38 = vpop.f32.mrb[23].mxu0 }
 0x667   :  { %4027 = vpow2.f32 %v1766_v48 }
 0x669   :  { %v4493_v44 = vpop.f32.mrb[24].mxu0 }
 0x66a   :  { %v3884_v47 = vpop.f32.mrb[25].mxu0 }
 0x66f   :  { %v4024_v51 = vpop.eup %4023 }
 0x670   :  { %v4026_v52 = vpop.eup %4025  ;;  %v1674_v53 = vadd.f32 1.0, %v4024_v51 }
 0x671   :  { %v1682_v54 = vadd.f32 1.0, %v4026_v52  ;;  %v4028_v56 = vpop.eup %4027  ;;  %v2195_v52 = vpop.xlane.xlu1 %2194 }
 0x672   :  { %4029 = vrcp.f32 %v1674_v53 }
 0x673   :  { %4031 = vrcp.f32 %v1682_v54 }
 0x679   :  { %92 = vperm.xlu0 %3981, %v4428_v5  }
 0x67c   :  { %v4030_v62 = vpop.eup %4029 }
 0x67d   :  { %v1768_v21 = vmul.f32 %v4030_v62, %v4028_v56  ;;  %v4032_v0 = vpop.eup %4031  ;;  %v2455_v56 = vpop.permute.xlu1 %2454 }
 0x67e   :  { %v4543_v62 = vpop.f32.mrb[26].mxu0 }
 0x67f   :  { %v1769_v11 = vsel %vm327_vm2, %v1768_v21, 0.0  ;;  %v1773_v58 = vmul.f32 %v4032_v0, %v1768_v21  ;;  %v3894_v21 = vpop.f32.mrb[27].mxu0 }
 0x680   :  { %1770 = vadd.xlane.f32.xlu1 %v1769_v11 }
 0x681   :  { %3848 = vmatmul.mubr.msk.f32.vlgmr.msra.gmra.mrb[20].mxu1 %vm327_vm2, %v1773_v58 }
 0x682   :  { %3856 = vmatpush3.xpose.msk.msra.mxu1 %vm144_vm0, %v4370_v55  ;;  %3857 = vmatprep.mubr.msk.f32.mxu1 %vm4096_vm1, %v4095_v4 }
 0x683   :  { %3865 = vmatprep.subr.mxu1 %v4095_v4 }
 0x685   :  { %3858 = vmatmul.mubr.msk.f32.vlgmr.msra.gmra.mrb[22].mxu1 %vm144_vm0, %v4370_v55  ;;  %v2442_v55 = vsel %vm327_vm2, %v4493_v44, -inf }
 0x686   :  { %3866 = vmatpush3.msra.mxu1 %v2115_v36  ;;  %3867 = vmatprep.mubr.msk.f32.mxu1 %vm4096_vm1, %v4095_v4 }
 0x687   :  { %3875 = vmatprep.subr.mxu1 %v4095_v4 }
 0x6f0   :  { %v2104_v59 = vpop.xlane.xlu0 %2103 }
 0x6f1   :  { %v2105_v14 = vsub.f32 %v4487_v35, %v2104_v59 }
 0x6f3   :  { %v2106_v1 = vmul.f32 1.442695, %v2105_v14 }
 0x6f8   :  { %v4509_v63 = vpop.permute.xlu0 %92 }
 0x6f9   :  { %v130_v16 = vmul.f32 %v4154_v7, %v4509_v63 }
 0x6fb   :  { %v4514_v6 = vadd.f32 %v4161_v9, %v130_v16 }
 0x6fd   :  { %2706 = vrot.lane.b32.xlu0 %v4514_v6, %s4099_s25 }
 0x71c   :  { %2443 = vmax.xlane.f32.xlu0 %v2442_v55 }
 0x754   :  { %v4520_v20 = vpop.f32.mrb[20].mxu1 }
 0x755   :  { %v3849_v23 = vpop.f32.mrb[21].mxu1 }
 0x758   :  { %v1997_v26 = vpop.f32.mrb[22].mxu1 }
 0x759   :  { %v2006_v24 = vmul.f32 2.0, %v1997_v26  ;;  %v3859_v7 = vpop.f32.mrb[23].mxu1 }
 0x75b   :  { %v2007_v31 = vsub.f32 %v2005_v27, %v2006_v24 }
 0x75d   :  { %v2008_v9 = vmax.f32 %v2007_v31, 0.0 }
 0x75f   :  { %v2009_v32 = vmul.f32 %v2008_v9, %v4218_v43  ;;  %v2017_v57 = vmul.f32 %v2008_v9, %v4221_v45 }
 0x761   :  { %v2010_v33 = vadd.f32 %v2009_v32, %v4223_v46  ;;  %v2018_v34 = vadd.f32 %v2017_v57, %v4227_v49 }
 0x763   :  { %v3599_v35 = vmul.f32 -1.442695, %v2010_v33  ;;  %v3600_v37 = vmul.f32 -1.442695, %v2018_v34 }
 0x765   :  { %4033 = vpow2.f32 %v3599_v35 }
 0x766   :  { %4035 = vpow2.f32 %v3600_v37 }
 0x767   :  { %4037 = vpow2.f32 %v2106_v1 }
 0x76f   :  { %v4034_v15 = vpop.eup %4033  ;;  %v2707_v39 = vpop.permute.xlu0 %2706 }
 0x770   :  { %v4036_v13 = vpop.eup %4035  ;;  %v2014_v41 = vadd.f32 1.0, %v4034_v15  ;;  %3901 = vmatpush3.xpose.msk.msra.mxu0 %vm327_vm2, %v2707_v39  ;;  %v409_v15 = vsel %vm327_vm2, %v4237_v2, 0.0  ;;  %v35_v2 = vld [vmem:[%s4766_s1 + $0x8] sm:$0xff] }
 0x771   :  { %v2022_v38 = vadd.f32 1.0, %v4036_v13  ;;  %v4038_v42 = vpop.eup %4037  ;;  %3910 = vmatprep.subr.mxu0 %v35_v2 }
 0x772   :  { %4039 = vrcp.f32 %v2014_v41 }
 0x773   :  { %3903 = vmatmul.mubr.msk.f32.vlgmr.msra.gmra.mrb[28].mxu0 %vm327_vm2, %v4514_v6  ;;  %4041 = vrcp.f32 %v2022_v38 }
 0x774   :  { %3911 = vmatpush3.msra.mxu0 %v35_v2 }
 0x77c   :  { %v4040_v47 = vpop.eup %4039 }
 0x77d   :  { %v2108_v48 = vmul.f32 %v4040_v47, %v4038_v42  ;;  %v4042_v51 = vpop.eup %4041 }
 0x77f   :  { %v2109_v53 = vsel %vm327_vm2, %v2108_v48, 0.0  ;;  %v2113_v54 = vmul.f32 %v4042_v51, %v2108_v48  ;;  %v2535_v48 = vpop.xlane.xlu1 %2534 }
 0x780   :  { %2110 = vadd.xlane.f32.xlu1 %v2109_v53 }
 0x781   :  { %3868 = vmatmul.mubr.msk.f32.vlgmr.msra.gmra.mrb[24].mxu1 %vm327_vm2, %v2113_v54 }
 0x782   :  { %3876 = vmatpush3.xpose.msk.msra.mxu1 %vm144_vm0, %v4344_v29  ;;  %3877 = vmatprep.mubr.msk.f32.mxu1 %vm4096_vm1, %v4095_v4 }
 0x783   :  { %3885 = vmatprep.subr.mxu1 %v4095_v4  ;;  %v751_v51 = vpop.xlane.xlu1 %750 }
 0x785   :  { %3878 = vmatmul.mubr.msk.f32.vlgmr.msra.gmra.mrb[26].mxu1 %vm144_vm0, %v4344_v29  ;;  %v2344_v29 = vrot.slane %v4491_v40, %v4205_v30 }
 0x786   :  { %3886 = vmatpush3.msra.mxu1 %v2455_v56  ;;  %3887 = vmatprep.mubr.msk.f32.mxu1 %vm4096_vm1, %v4095_v4 }
 0x787   :  { %3895 = vmatprep.subr.mxu1 %v4095_v4  ;;  %v2345_v14 = vadd.f32 %v2344_v29, %v2195_v52  ;;  %v1091_v52 = vpop.xlane.xlu1 %1090 }
 0x788   :  { %v1092_v54 = vadd.f32 1e-20, %v1091_v52 }
 0x78b   :  { %v1431_v53 = vpop.xlane.xlu1 %1430 }
 0x78f   :  { %v1771_v21 = vpop.xlane.xlu1 %1770 }
 0x790   :  { %v1772_v29 = vadd.f32 1e-20, %v1771_v21 }
 0x7a9   :  { %v2444_v9 = vpop.xlane.xlu0 %2443 }
 0x7aa   :  { %v2445_v32 = vsub.f32 %v4493_v44, %v2444_v9 }
 0x7ac   :  { %v2446_v57 = vmul.f32 1.442695, %v2445_v32  ;;  %v2684_v32 = vrot.slane %v4543_v62, %v4205_v30 }
 0x846   :  { %v4545_v0 = vpop.f32.mrb[28].mxu0 }
 0x847   :  { %v3904_v11 = vpop.f32.mrb[29].mxu0  ;;  %v2782_v58 = vsel %vm327_vm2, %v4545_v0, -inf }
 0x848   :  { %2783 = vmax.xlane.f32.xlu0 %v2782_v58  ;;  %v1432_v58 = vadd.f32 1e-20, %v1431_v53  ;;  %v4617_v53 = vld [vmem:[%s4766_s1 + $0x1] ss:$0 sm:$0xff] }
 0x854   :  { %v4549_v36 = vpop.f32.mrb[24].mxu1 }
 0x855   :  { %v3869_v50 = vpop.f32.mrb[25].mxu1 }
 0x856   :  { %v2111_v50 = vpop.xlane.xlu1 %2110 }
 0x858   :  { %v2337_v59 = vpop.f32.mrb[26].mxu1 }
 0x859   :  { %v2346_v16 = vmul.f32 2.0, %v2337_v59  ;;  %v3879_v55 = vpop.f32.mrb[27].mxu1  ;;  %v2112_v59 = vadd.f32 1e-20, %v2111_v50 }
 0x85b   :  { %v2347_v22 = vsub.f32 %v2345_v14, %v2346_v16 }
 0x85d   :  { %v2348_v23 = vmax.f32 %v2347_v22, 0.0 }
 0x85e   :  { %2794 = vrot.lane.b32.xlu0 %v4514_v6, %s4098_s24 }
 0x85f   :  { %v2349_v26 = vmul.f32 %v2348_v23, %v4218_v43  ;;  %v2357_v27 = vmul.f32 %v2348_v23, %v4221_v45 }
 0x861   :  { %v2350_v24 = vadd.f32 %v2349_v26, %v4223_v46  ;;  %v2358_v7 = vadd.f32 %v2357_v27, %v4227_v49 }
 0x863   :  { %v3608_v31 = vmul.f32 -1.442695, %v2350_v24  ;;  %v3609_v40 = vmul.f32 -1.442695, %v2358_v7 }
 0x865   :  { %4043 = vpow2.f32 %v3608_v31 }
 0x866   :  { %4045 = vpow2.f32 %v3609_v40 }
 0x867   :  { %4047 = vpow2.f32 %v2446_v57 }
 0x86f   :  { %v4044_v33 = vpop.eup %4043 }
 0x870   :  { %v4046_v34 = vpop.eup %4045  ;;  %v2354_v35 = vadd.f32 1.0, %v4044_v33  ;;  %v2685_v33 = vadd.f32 %v2684_v32, %v2535_v48 }
 0x871   :  { %v2362_v6 = vadd.f32 1.0, %v4046_v34  ;;  %v4048_v37 = vpop.eup %4047 }
 0x872   :  { %4049 = vrcp.f32 %v2354_v35 }
 0x873   :  { %4051 = vrcp.f32 %v2362_v6 }
 0x87c   :  { %v4050_v1 = vpop.eup %4049 }
 0x87d   :  { %410 = vadd.xlane.f32.xlu0 %v409_v15  ;;  %v2448_v39 = vmul.f32 %v4050_v1, %v4048_v37  ;;  %v4052_v13 = vpop.eup %4051 }
 0x87f   :  { %v2449_v41 = vsel %vm327_vm2, %v2448_v39, 0.0  ;;  %v2453_v38 = vmul.f32 %v4052_v13, %v2448_v39 }
 0x880   :  { %2450 = vadd.xlane.f32.xlu1 %v2449_v41 }
 0x881   :  { %3888 = vmatmul.mubr.msk.f32.vlgmr.msra.gmra.mrb[28].mxu1 %vm327_vm2, %v2453_v38 }
 0x882   :  { %3896 = vmatpush3.xpose.msk.msra.mxu1 %vm144_vm0, %v4428_v5  ;;  %3897 = vmatprep.mubr.msk.f32.mxu1 %vm4096_vm1, %v4095_v4 }
 0x883   :  { %3905 = vmatprep.subr.mxu1 %v4095_v4 }
 0x885   :  { %3898 = vmatmul.mubr.msk.f32.vlgmr.msra.gmra.mrb[30].mxu1 %vm144_vm0, %v4428_v5  ;;  %v752_v5 = vadd.f32 1e-20, %v751_v51 }
 0x886   :  { %3907 = vmatprep.mubr.msk.f32.mxu1 %vm4096_vm1, %v4095_v4 }
 0x887   :  { %4053 = vrcp.f32 %v752_v5 }
 0x888   :  { %4055 = vrcp.f32 %v1092_v54 }
 0x8d5   :  { %v4576_v44 = vpop.xlane.xlu0 %2783 }
 0x8d6   :  { %v2785_v42 = vsub.f32 %v4545_v0, %v4576_v44  ;;  %v4054_v0 = vpop.eup %4053 }
 0x8d7   :  { %v4056_v14 = vpop.eup %4055  ;;  %v831_v22 = vmul.f32 %v4054_v0, %v4329_v12 }
 0x8d8   :  { %v1171_v23 = vmul.f32 %v4056_v14, %v4417_v19  ;;  %v2786_v62 = vmul.f32 1.442695, %v2785_v42  ;;  %v4608_v42 = vld [vmem:[%s4766_s1] ss:$0 sm:$0xff] }
 0x8d9   :  { %v2795_v47 = vpop.permute.xlu0 %2794  ;;  %v100_v52 = vmul.f32 %v4608_v42, %v4163_v10  ;;  %v99_v5 = vmul.f32 %v4608_v42, %v4156_v8  ;;  %v102_v54 = vmul.f32 %v4608_v42, %v4277_v25  ;;  %v101_v21 = vmul.f32 %v4608_v42, %v4230_v60  ;;  %v4628_v8 = vld [vmem:[%s4766_s1 + $0x4] ss:$0 sm:$0xff] }
 0x8da   :  { %3906 = vmatpush3.msra.mxu1 %v2795_v47  ;;  %v103_v0 = vmul.f32 %v4608_v42, %v4331_v18 }
 0x8db   :  { %v114_v25 = vadd.f32 %v4617_v53, %v102_v54 }
 0x90a   :  { %v411_v56 = vpop.xlane.xlu0 %410 }
 0x90b   :  { %v412_v11 = vadd.f32 1e-20, %v411_v56  ;;  %v112_v56 = vadd.f32 %v4617_v53, %v100_v52  ;;  %v106_v52 = vmul.f32 %v4608_v42, %v4509_v63 }
 0x90d   :  { %4057 = vrcp.f32 %v412_v11  ;;  %v2451_v12 = vpop.xlane.xlu1 %2450  ;;  %v118_v54 = vadd.f32 %v4617_v53, %v106_v52 }
 0x90e   :  { %4059 = vrcp.f32 %v1432_v58  ;;  %v2452_v19 = vadd.f32 1e-20, %v2451_v12  ;;  %v111_v58 = vadd.f32 %v4617_v53, %v99_v5  ;;  %v105_v5 = vmul.f32 %v4608_v42, %v4393_v61  ;;  %v4713_v61 = vld [vmem:[%s4766_s1 + $0x6] ss:$0 sm:$0xff] }
 0x90f   :  { %4061 = vrcp.f32 %v1772_v29 }
 0x910   :  { %4063 = vrcp.f32 %v2112_v59  ;;  %v104_v59 = vmul.f32 %v4608_v42, %v4403_v3 }
 0x911   :  { %4065 = vrcp.f32 %v2452_v19 }
 0x912   :  { %v116_v18 = vadd.f32 %v4617_v53, %v104_v59 }
 0x917   :  { %v4058_v16 = vpop.eup %4057 }
 0x918   :  { %v491_v55 = vmul.f32 %v4058_v16, %v4284_v28  ;;  %v4060_v26 = vpop.eup %4059  ;;  %v113_v16 = vadd.f32 %v4617_v53, %v101_v21  ;;  %v117_v21 = vadd.f32 %v4617_v53, %v105_v5 }
 0x919   :  { %v4062_v27 = vpop.eup %4061  ;;  %v1511_v24 = vmul.f32 %v4060_v26, %v4478_v17 }
 0x91a   :  { %3912 = vmatprep.mubr.msk.f32.mxu0 %vm327_vm2, %v491_v55  ;;  %v1851_v7 = vmul.f32 %v4062_v27, %v4520_v20  ;;  %v4064_v31 = vpop.eup %4063 }
 0x91b   :  { %3913 = vmatmul.mubr.msk.f32.vlgmr.msra.gmra.mrb[30].mxu0 %vm327_vm2, %v831_v22  ;;  %v2191_v28 = vmul.f32 %v4064_v31, %v4549_v36  ;;  %v4066_v40 = vpop.eup %4065 }
 0x91c   :  { %3915 = vmatprep.mubr.msk.f32.mxu0 %vm327_vm2, %v1171_v23 }
 0x91f   :  { %3916 = vmatmul.mubr.msk.f32.gmra.mrb[32].mxu0 %vm327_vm2, %v1511_v24  ;;  %v115_v24 = vadd.f32 %v4617_v53, %v103_v0 }
 0x920   :  { %3918 = vmatprep.mubr.msk.f32.mxu0 %vm327_vm2, %v1851_v7 }
 0x923   :  { %3919 = vmatmul.mubr.msk.f32.gmra.mrb[34].mxu0 %vm327_vm2, %v2191_v28 }
 0x954   :  { %v2526_v9 = vpop.f32.mrb[28].mxu1 }
 0x955   :  { %v2531_v17 = vmul.f32 %v4066_v40, %v2526_v9  ;;  %v3889_v57 = vpop.f32.mrb[29].mxu1 }
 0x956   :  { %v38_v57 = vld [vmem:[%s4766_s1 + $0x20] sm:$0xff] }
 0x957   :  { %3921 = vmatprep.mubr.msk.f32.mxu0 %vm327_vm2, %v2531_v17  ;;  %v37_v17 = vld [vmem:[%s4766_s1 + $0x18] sm:$0xff] }
 0x958   :  { %v2677_v20 = vpop.f32.mrb[30].mxu1 }
 0x959   :  { %v2686_v34 = vmul.f32 2.0, %v2677_v20  ;;  %v3899_v35 = vpop.f32.mrb[31].mxu1  ;;  %v3966_v20 = vpack.c.bf16 %v38_v57, %v37_v17 }
 0x95b   :  { %v2687_v6 = vsub.f32 %v2685_v33, %v2686_v34  ;;  %3967 = vmatprep.subr.bf16.mxu0 %v3966_v20 }
 0x95c   :  { %3969 = vmatpush3.bf16.msra.mxu0 %v3966_v20 }
 0x95d   :  { %v2688_v36 = vmax.f32 %v2687_v6, 0.0 }
 0x95f   :  { %v2689_v37 = vmul.f32 %v2688_v36, %v4218_v43  ;;  %v2697_v1 = vmul.f32 %v2688_v36, %v4221_v45  ;;  %v36_v43 = vld [vmem:[%s4766_s1 + $0x10] sm:$0xff]  ;;  %v4678_v36 = vld [vmem:[%s4766_s1 + $0x5] ss:$0 sm:$0xff] }
 0x960   :  { %3924 = vmatprep.subr.mxu1 %v36_v43 }
 0x961   :  { %v2690_v15 = vadd.f32 %v2689_v37, %v4223_v46  ;;  %v2698_v39 = vadd.f32 %v2697_v1, %v4227_v49 }
 0x963   :  { %v3617_v13 = vmul.f32 -1.442695, %v2690_v15  ;;  %v3618_v30 = vmul.f32 -1.442695, %v2698_v39 }
 0x965   :  { %4067 = vpow2.f32 %v3617_v13 }
 0x966   :  { %4069 = vpow2.f32 %v3618_v30 }
 0x967   :  { %4071 = vpow2.f32 %v2786_v62 }
 0x96f   :  { %v4068_v41 = vpop.eup %4067 }
 0x970   :  { %v4070_v38 = vpop.eup %4069  ;;  %v2694_v2 = vadd.f32 1.0, %v4068_v41 }
 0x971   :  { %v2702_v44 = vadd.f32 1.0, %v4070_v38  ;;  %v4072_v45 = vpop.eup %4071 }
 0x972   :  { %4073 = vrcp.f32 %v2694_v2 }
 0x973   :  { %4075 = vrcp.f32 %v2702_v44 }
 0x97c   :  { %v4074_v46 = vpop.eup %4073 }
 0x97d   :  { %v2788_v49 = vmul.f32 %v4074_v46, %v4072_v45  ;;  %v4076_v47 = vpop.eup %4075 }
 0x97f   :  { %v2789_v48 = vsel %vm327_vm2, %v2788_v49, 0.0  ;;  %v2793_v51 = vmul.f32 %v4076_v47, %v2788_v49 }
 0x980   :  { %2790 = vadd.xlane.f32.xlu0 %v2789_v48 }
 0x981   :  { %3908 = vmatmul.mubr.msk.f32.vlgmr.msra.gmra.mrb[32].mxu1 %vm327_vm2, %v2793_v51 }
 0x982   :  { %3925 = vmatpush3.msra.mxu1 %v36_v43 }
 0x983   :  { %3954 = vmatprep.subr.mxu1 %v4095_v4 }
 0x9ee   :  { %v3914_v11 = vpop.f32.mrb[30].mxu0 }
 0x9ef   :  { %v3002_v10 = vadd.f32 %v3914_v11, %v112_v56  ;;  %v2962_v29 = vpop.f32.mrb[31].mxu0 }
 0x9f0   :  { %v3001_v50 = vadd.f32 %v2962_v29, %v111_v58 }
 0x9f1   :  { %v4640_v55 = vadd.f32 %v4628_v8, %v3002_v10 }
 0x9f2   :  { %v4636_v60 = vadd.f32 %v4628_v8, %v3001_v50  ;;  %v3917_v14 = vpop.f32.mrb[32].mxu0 }
 0x9f3   :  { %v3004_v22 = vadd.f32 %v3917_v14, %v114_v25  ;;  %v2972_v23 = vpop.f32.mrb[33].mxu0 }
 0x9f4   :  { %v3003_v26 = vadd.f32 %v2972_v23, %v113_v16  ;;  %3926 = vmatprep.mubr.msk.f32.mxu1 %vm327_vm2, %v4636_v60 }
 0x9f5   :  { %3927 = vmatmul.mubr.msk.f32.vlgmr.msra.gmra.mrb[34].mxu1 %vm327_vm2, %v4640_v55  ;;  %v4652_v7 = vadd.f32 %v4628_v8, %v3004_v22 }
 0x9f6   :  { %v4648_v3 = vadd.f32 %v4628_v8, %v3003_v26  ;;  %v3920_v27 = vpop.f32.mrb[34].mxu0 }
 0x9f7   :  { %v3006_v31 = vadd.f32 %v3920_v27, %v116_v18  ;;  %v2982_v28 = vpop.f32.mrb[35].mxu0 }
 0x9f8   :  { %v3005_v12 = vadd.f32 %v2982_v28, %v115_v24  ;;  %3929 = vmatprep.mubr.msk.f32.mxu1 %vm327_vm2, %v4648_v3 }
 0x9f9   :  { %3930 = vmatmul.mubr.msk.f32.gmra.mrb[36].mxu1 %vm327_vm2, %v4652_v7  ;;  %v4662_v40 = vadd.f32 %v4628_v8, %v3006_v31 }
 0x9fa   :  { %v4659_v19 = vadd.f32 %v4628_v8, %v3005_v12 }
 0x9fc   :  { %3932 = vmatprep.mubr.msk.f32.mxu1 %vm327_vm2, %v4659_v19 }
 0x9fd   :  { %3933 = vmatmul.mubr.msk.f32.gmra.mrb[38].mxu1 %vm327_vm2, %v4662_v40 }
 0xa0d   :  { %v2791_v9 = vpop.xlane.xlu0 %2790 }
 0xa0e   :  { %v2792_v32 = vadd.f32 1e-20, %v2791_v9 }
 0xa10   :  { %4077 = vrcp.f32 %v2792_v32 }
 0xa1a   :  { %v4078_v33 = vpop.eup %4077 }
 0xa54   :  { %v2866_v34 = vpop.f32.mrb[32].mxu1 }
 0xa55   :  { %v2871_v35 = vmul.f32 %v4078_v33, %v2866_v34  ;;  %v3909_v6 = vpop.f32.mrb[33].mxu1 }
 0xa57   :  { %3922 = vmatmul.mubr.msk.f32.gmra.mrb[36].mxu0 %vm327_vm2, %v2871_v35 }
 0xac8   :  { %v3928_v37 = vpop.f32.mrb[34].mxu1 }
 0xac9   :  { %v3121_v1 = vadd.f32 %v3928_v37, %v4678_v36  ;;  %v3115_v15 = vpop.f32.mrb[35].mxu1 }
 0xaca   :  { %v3116_v39 = vadd.f32 %v4678_v36, %v3115_v15 }
 0xacb   :  { %v3155_v62 = vmax.f32 %v3121_v1, 0.0 }
 0xacc   :  { %v3154_v13 = vmax.f32 %v3116_v39, 0.0  ;;  %v3931_v30 = vpop.f32.mrb[36].mxu1 }
 0xacd   :  { %v3131_v41 = vadd.f32 %v3931_v30, %v4678_v36  ;;  %v3125_v38 = vpop.f32.mrb[37].mxu1 }
 0xace   :  { %v3126_v2 = vadd.f32 %v4678_v36, %v3125_v38  ;;  %3942 = vmatprep.mubr.msk.f32.mxu0 %vm3162_vm3, %v3154_v13 }
 0xacf   :  { %3943 = vmatmul.mubr.msk.f32.vlgmr.msra.gmra.mrb[38].mxu0 %vm3162_vm3, %v3155_v62  ;;  %v3157_v45 = vmax.f32 %v3131_v41, 0.0 }
 0xad0   :  { %v3156_v44 = vmax.f32 %v3126_v2, 0.0  ;;  %v3934_v43 = vpop.f32.mrb[38].mxu1 }
 0xad1   :  { %v3141_v46 = vadd.f32 %v3934_v43, %v4678_v36  ;;  %v3135_v49 = vpop.f32.mrb[39].mxu1 }
 0xad2   :  { %v3136_v47 = vadd.f32 %v4678_v36, %v3135_v49  ;;  %3945 = vmatprep.mubr.msk.f32.mxu0 %vm3162_vm3, %v3156_v44 }
 0xad3   :  { %3946 = vmatmul.mubr.msk.f32.gmra.mrb[40].mxu0 %vm3162_vm3, %v3157_v45  ;;  %v3159_v51 = vmax.f32 %v3141_v46, 0.0 }
 0xad4   :  { %v3158_v48 = vmax.f32 %v3136_v47, 0.0 }
 0xad6   :  { %3948 = vmatprep.mubr.msk.f32.mxu0 %vm3162_vm3, %v3158_v48 }
 0xad7   :  { %3949 = vmatmul.mubr.msk.f32.gmra.mrb[42].mxu0 %vm3162_vm3, %v3159_v51 }
 0xb2a   :  { %v3923_v56 = vpop.f32.mrb[36].mxu0 }
 0xb2b   :  { %v3008_v11 = vadd.f32 %v3923_v56, %v118_v54  ;;  %v2992_v58 = vpop.f32.mrb[37].mxu0 }
 0xb2c   :  { %v3007_v10 = vadd.f32 %v2992_v58, %v117_v21 }
 0xb2d   :  { %v4702_v50 = vadd.f32 %v4628_v8, %v3008_v11 }
 0xb2e   :  { %v4699_v29 = vadd.f32 %v4628_v8, %v3007_v10 }
 0xb30   :  { %3935 = vmatprep.mubr.msk.f32.mxu1 %vm327_vm2, %v4699_v29 }
 0xb31   :  { %3936 = vmatmul.mubr.msk.f32.gmra.mrb[40].mxu1 %vm327_vm2, %v4702_v50 }
 0xb32   :  { %3956 = vmatprep.mubr.msk.f32.mxu1 %vm4096_vm1, %v4095_v4 }
 0xba2   :  { %v3944_v63 = vpop.f32.mrb[38].mxu0 }
 0xba3   :  { %v3293_v42 = vadd.f32 %v3944_v63, %v4640_v55  ;;  %v3253_v53 = vpop.f32.mrb[39].mxu0 }
 0xba4   :  { %v3292_v8 = vadd.f32 %v3253_v53, %v4636_v60 }
 0xba5   :  { %v3305_v59 = vadd.f32 %v4713_v61, %v3293_v42 }
 0xba6   :  { %v3304_v25 = vadd.f32 %v4713_v61, %v3292_v8  ;;  %v3947_v0 = vpop.f32.mrb[40].mxu0 }
 0xba7   :  { %v3319_v14 = vsel %vm327_vm2, %v3305_v59, -inf  ;;  %v3295_v16 = vadd.f32 %v3947_v0, %v4652_v7  ;;  %v3263_v22 = vpop.f32.mrb[41].mxu0 }
 0xba8   :  { %v3320_v23 = vrot.slane %v3319_v14, 4  ;;  %v3312_v26 = vsel %vm327_vm2, %v3304_v25, -inf  ;;  %v3294_v18 = vadd.f32 %v3263_v22, %v4648_v3 }
 0xba9   :  { %v3313_v27 = vrot.slane %v3312_v26, 4  ;;  %v3307_v55 = vadd.f32 %v4713_v61, %v3295_v16 }
 0xbaa   :  { %v3321_v24 = vmax.f32 %v3319_v14, %v3320_v23  ;;  %v3306_v60 = vadd.f32 %v4713_v61, %v3294_v18  ;;  %v3950_v31 = vpop.f32.mrb[42].mxu0  ;;  %v39_v18 = vld [vmem:[%s4766_s1 + $0x28] sm:$0xff] }
 0xbab   :  { %v3314_v28 = vmax.f32 %v3312_v26, %v3313_v27  ;;  %v3333_v12 = vsel %vm327_vm2, %v3307_v55, -inf  ;;  %v3297_v9 = vadd.f32 %v3950_v31, %v4662_v40  ;;  %v3273_v32 = vpop.f32.mrb[43].mxu0  ;;  %3955 = vmatpush3.msra.mxu1 %v39_v18 }
 0xbac   :  { %v3322_v7 = vrot.slane %v3321_v24, 2  ;;  %v3334_v17 = vrot.slane %v3333_v12, 4  ;;  %v3326_v57 = vsel %vm327_vm2, %v3306_v60, -inf  ;;  %v3296_v20 = vadd.f32 %v3273_v32, %v4659_v19 }
 0xbad   :  { %v3315_v3 = vrot.slane %v3314_v28, 2  ;;  %v3327_v33 = vrot.slane %v3326_v57, 4  ;;  %v3309_v34 = vadd.f32 %v4713_v61, %v3297_v9 }
 0xbae   :  { %v3323_v35 = vmax.f32 %v3321_v24, %v3322_v7  ;;  %v3335_v6 = vmax.f32 %v3333_v12, %v3334_v17  ;;  %v3308_v37 = vadd.f32 %v4713_v61, %v3296_v20 }
 0xbaf   :  { %v3316_v1 = vmax.f32 %v3314_v28, %v3315_v3  ;;  %v3328_v15 = vmax.f32 %v3326_v57, %v3327_v33  ;;  %v3347_v39 = vsel %vm327_vm2, %v3309_v34, -inf }
 0xbb0   :  { %v3324_v40 = vrot.slane %v3323_v35, 1  ;;  %v3336_v13 = vrot.slane %v3335_v6, 2  ;;  %v3348_v30 = vrot.slane %v3347_v39, 4  ;;  %v3340_v62 = vsel %vm327_vm2, %v3308_v37, -inf  ;;  %v40_v37 = vld [vmem:[%s4766_s1 + $0x30] sm:$0xff] }
 0xbb1   :  { %v3317_v41 = vrot.slane %v3316_v1, 1  ;;  %v3329_v38 = vrot.slane %v3328_v15, 2  ;;  %v3341_v19 = vrot.slane %v3340_v62, 4 }
 0xbb2   :  { %v3325_v2 = vmax.f32 %v3323_v35, %v3324_v40  ;;  %v3337_v44 = vmax.f32 %v3335_v6, %v3336_v13  ;;  %v3349_v43 = vmax.f32 %v3347_v39, %v3348_v30  ;;  %v4100_v39 = vmov 0.0|0.0   ;;  %v3649_v40 = vld [vmem:[%s4766_s1 + $0x7] ss:$0 sm:$0xff] }
 0xbb3   :  { %v3318_v45 = vmax.f32 %v3316_v1, %v3317_v41  ;;  %v3330_v46 = vmax.f32 %v3328_v15, %v3329_v38  ;;  %v3342_v49 = vmax.f32 %v3340_v62, %v3341_v19  ;;  %v41_v1 = vld [vmem:[%s4766_s1 + $0x38] sm:$0xff]  ;;  %3970 = vmatprep.subr.bf16.mxu1 %v4100_v39  ;;  %v3651_v41 = vld [vmem:[%s4766_s1 + $0x40] ss:$0 sm:$0xff] }
 0xbb4   :  { %v3338_v47 = vrot.slane %v3337_v44, 1  ;;  %v3350_v48 = vrot.slane %v3349_v43, 2  ;;  %v3971_v15 = vpack.c.bf16 %v41_v1, %v40_v37 }
 0xbb5   :  { %v3369_v51 = vsel %vm3368_vm4, %v3318_v45, %v3325_v2  ;;  %v3331_v52 = vrot.slane %v3330_v46, 1  ;;  %v3343_v5 = vrot.slane %v3342_v49, 2 }
 0xbb6   :  { %v3351_v54 = vmax.f32 %v3349_v43, %v3350_v48  ;;  %v3339_v11 = vmax.f32 %v3337_v44, %v3338_v47 }
 0xbb7   :  { %v3332_v56 = vmax.f32 %v3330_v46, %v3331_v52  ;;  %v3344_v21 = vmax.f32 %v3342_v49, %v3343_v5 }
 0xbb8   :  { %v3352_v58 = vrot.slane %v3351_v54, 1 }
 0xbb9   :  { %v3371_v10 = vsel %vm3370_vm5, %v3369_v51, %v3332_v56  ;;  %v3345_v63 = vrot.slane %v3344_v21, 1 }
 0xbba   :  { %v3373_v42 = vsel %vm3372_vm6, %v3371_v10, %v3339_v11  ;;  %v3353_v8 = vmax.f32 %v3351_v54, %v3352_v58 }
 0xbbb   :  { %v3346_v53 = vmax.f32 %v3344_v21, %v3345_v63 }
 0xbbd   :  { %v3375_v59 = vsel %vm3374_vm7, %v3373_v42, %v3346_v53 }
 0xbbe   :  { %v3377_v25 = vsel %vm3376_vm8, %v3375_v59, %v3353_v8 }
 0xc04   :  { %v3937_v0 = vpop.f32.mrb[40].mxu1 }
 0xc05   :  { %v3151_v14 = vadd.f32 %v3937_v0, %v4678_v36  ;;  %v3145_v16 = vpop.f32.mrb[41].mxu1 }
 0xc06   :  { %v3146_v22 = vadd.f32 %v4678_v36, %v3145_v16 }
 0xc07   :  { %v3161_v26 = vmax.f32 %v3151_v14, 0.0 }
 0xc08   :  { %v3160_v23 = vmax.f32 %v3146_v22, 0.0 }
 0xc0a   :  { %3951 = vmatprep.mubr.msk.f32.mxu0 %vm3162_vm3, %v3160_v23 }
 0xc0b   :  { %3952 = vmatmul.mubr.msk.f32.gmra.mrb[44].mxu0 %vm3162_vm3, %v3161_v26 }
 0xcde   :  { %v3953_v27 = vpop.f32.mrb[44].mxu0 }
 0xcdf   :  { %v3299_v55 = vadd.f32 %v3953_v27, %v4702_v50  ;;  %v3283_v24 = vpop.f32.mrb[45].mxu0 }
 0xce0   :  { %v3298_v60 = vadd.f32 %v3283_v24, %v4699_v29 }
 0xce1   :  { %v3311_v31 = vadd.f32 %v4713_v61, %v3299_v55 }
 0xce2   :  { %v3310_v36 = vadd.f32 %v4713_v61, %v3298_v60 }
 0xce3   :  { %v3361_v28 = vsel %vm327_vm2, %v3311_v31, -inf }
 0xce4   :  { %v3362_v12 = vrot.slane %v3361_v28, 4  ;;  %v3354_v9 = vsel %vm327_vm2, %v3310_v36, -inf }
 0xce5   :  { %v3355_v32 = vrot.slane %v3354_v9, 4 }
 0xce6   :  { %v3363_v7 = vmax.f32 %v3361_v28, %v3362_v12 }
 0xce7   :  { %v3356_v17 = vmax.f32 %v3354_v9, %v3355_v32 }
 0xce8   :  { %v3364_v57 = vrot.slane %v3363_v7, 2 }
 0xce9   :  { %v3357_v20 = vrot.slane %v3356_v17, 2 }
 0xcea   :  { %v3365_v3 = vmax.f32 %v3363_v7, %v3364_v57 }
 0xceb   :  { %v3358_v33 = vmax.f32 %v3356_v17, %v3357_v20 }
 0xcec   :  { %v3366_v50 = vrot.slane %v3365_v3, 1 }
 0xced   :  { %v3359_v34 = vrot.slane %v3358_v33, 1 }
 0xcee   :  { %v3367_v35 = vmax.f32 %v3365_v3, %v3366_v50 }
 0xcef   :  { %v3360_v29 = vmax.f32 %v3358_v33, %v3359_v34 }
 0xcf1   :  { %v3379_v6 = vsel %vm3378_vm9, %v3377_v25, %v3360_v29 }
 0xcf2   :  { %v3381_v61 = vsel %vm3380_vm10, %v3379_v6, %v3367_v35 }
 0xcf3   :  { %3957 = vmatmul.mubr.msk.f32.vlgmr.msra.gmra.mrb[42].mxu1 %vm327_vm2, %v3381_v61 }
 0xcf4   :  { %3963 = vmatprep.mubr.msk.f32.mxu1 %vm4096_vm1, %v4095_v4  ;;  %3972 = vmatpush3.bf16.msra.mxu1 %v3971_v15 }
 0xdc6   :  { %v3455_v13 = vpop.f32.mrb[42].mxu1 }
 0xdc7   :  { %v3456_v30 = vadd.f32 %v3649_v40, %v3455_v13  ;;  %v3958_v62 = vpop.f32.mrb[43].mxu1 }
 0xdc9   :  { %v3459_v4 = vmax.f32 %v3456_v30, 0.0 }
 0xdcb   :  { %3964 = vmatmul.mubr.msk.f32.vlgmr.msra.gmra.mrb[44].mxu1 %vm3162_vm3, %v3459_v4 }
 0xe9e   :  { %v3533_v38 = vpop.f32.mrb[44].mxu1 }
 0xe9f   :  { %v3534_v19 = vadd.f32 %v3651_v41, %v3533_v38  ;;  %v3965_v2 = vpop.f32.mrb[45].mxu1 }
 0xea1   :  { %3537 = vst [vmem:[%s4768_s3] sm:$0xff] %v3534_v19 }
 0xea2   :  { %3542 = vsyncpa [#allocation3], 1 }

</bundles_post_ra>
